<compile_context>
chip_gen: v5e
topology: v5e:2x2
jax: 0.10.0
libtpu: 0.0.40
codegen_flags: <defaults>
</compile_context>

<pallas_src>
import math

import jax
import jax.numpy as jnp
from jax.experimental import pallas as pl
from jax.experimental.pallas import tpu as pltpu

# ----------------------------- config (synthetic "opts") ---------------------
LATENT = 32          # opts.latent
STYLE_DIM = 32       # opts.style_dim
N_HEADS = 4          # opts.n_heads
ATTN_LAYERS = 1      # opts.attn_layers
N_STYLES = 3         # opts.n_styles
USE_SET_DECODER = True       # opts.use_set_decoder (self-attention MAB first)
DISABLE_STYLE_CONCAT = False
LEAKY_SLOPE = 0.01           # nn.LeakyReLU default
FFN_HIDDEN = LATENT * 2

BATCH = 2
SET_SIZE = 8         # set size for both z and s

_MAB_NPARAMS = 12    # arrays per MAB block in the flat weight list


# ----------------------------- in-kernel helpers -----------------------------
def _mm(x, w):
    """MXU matmul: bf16 operands, f32 accumulation."""
    return jnp.dot(x.astype(jnp.bfloat16), w.astype(jnp.bfloat16),
                   preferred_element_type=jnp.float32)


def _layer_norm(x, g_ref, b_ref):
    mu = jnp.mean(x, axis=-1, keepdims=True)
    var = jnp.mean(jnp.square(x - mu), axis=-1, keepdims=True)
    y = (x - mu) * jax.lax.rsqrt(var + 1e-5)
    return y * g_ref[...] + b_ref[...]


def _mha(q2, k2, v2, b, nq, nk):
    """softmax(q k^T / sqrt(dh)) v over batches/heads; activations stay f32."""
    d = q2.shape[-1]
    dh = d // N_HEADS
    scale = 1.0 / math.sqrt(dh)
    q3 = q2.reshape(b, nq, d).astype(jnp.bfloat16)
    k3 = k2.reshape(b, nk, d).astype(jnp.bfloat16)
    v3 = v2.reshape(b, nk, d).astype(jnp.bfloat16)
    heads = []
    for h in range(N_HEADS):                      # unrolled at trace time
        sl = slice(h * dh, (h + 1) * dh)
        qh, kh, vh = q3[:, :, sl], k3[:, :, sl], v3[:, :, sl]
        s = jnp.einsum("bqd,bkd->bqk", qh, kh,
                       preferred_element_type=jnp.float32) * scale
        m = jnp.max(s, axis=-1, keepdims=True)
        p = jnp.exp(s - m)
        p = p * pl.reciprocal(jnp.sum(p, axis=-1, keepdims=True), approx=True)
        heads.append(jnp.einsum("bqk,bkd->bqd", p.astype(jnp.bfloat16), vh,
                                preferred_element_type=jnp.float32))
    return jnp.concatenate(heads, axis=-1).reshape(b * nq, d)


def _mab(x2, y2, p, *, b, nq, nk, fused_qkv):
    """Multihead Attention Block: h = LN(x + MHA(x,y,y)); out = LN(h + FFN(h))."""
    (wqkv, bqkv, wo, bo, ln1g, ln1b, w1, b1, w2, b2, ln2g, ln2b) = p
    d = x2.shape[-1]
    wqkv_v = wqkv[...]
    bqkv_v = bqkv[...]
    if fused_qkv:                                   # self-attn: one 32->96 matmul
        qkv = _mm(x2, wqkv_v) + bqkv_v
        q, k, v = qkv[:, :d], qkv[:, d:2 * d], qkv[:, 2 * d:]
    else:                                           # cross-attn: q from x, kv from y
        q = _mm(x2, wqkv_v[:, :d]) + bqkv_v[:, :d]
        kv = _mm(y2, wqkv_v[:, d:]) + bqkv_v[:, d:]
        k, v = kv[:, :d], kv[:, d:]
    o = _mha(q, k, v, b, nq, nk)
    o = _mm(o, wo[...]) + bo[...]
    h = _layer_norm(x2 + o, ln1g, ln1b)
    ff = _mm(h, w1[...]) + b1[...]
    ff = jnp.where(ff >= 0, ff, LEAKY_SLOPE * ff)   # LeakyReLU
    ff = _mm(ff, w2[...]) + b2[...]
    return _layer_norm(h + ff, ln2g, ln2b)


# ----------------------------- fused per-style kernel ------------------------
def _style_kernel(*refs):
    # refs = (s_ref, z_ref, *weight_refs, out_ref); style dim squeezed by BlockSpec.
    s_ref, z_ref = refs[0], refs[1]
    out_ref = refs[-1]
    w_refs = refs[2:-1]

    b, n, d = s_ref.shape
    s2 = s_ref[...].reshape(b * n, d).astype(jnp.float32)
    z2 = z_ref[...].reshape(b * n, d).astype(jnp.float32)

    idx = 0

    def take(k):
        nonlocal idx
        out = tuple(w_refs[idx:idx + k])
        idx += k
        return out

    x2 = s2
    for _ in range(ATTN_LAYERS):
        if USE_SET_DECODER:
            x2 = _mab(x2, x2, take(_MAB_NPARAMS), b=b, nq=n, nk=n, fused_qkv=True)
        x2 = _mab(x2, z2, take(_MAB_NPARAMS), b=b, nq=n, nk=n, fused_qkv=False)

    out_w, out_b = take(2)
    codes = _mm(x2, out_w[...]) + out_b[...]
    if not DISABLE_STYLE_CONCAT:
        sc_w, sc_b = take(2)
        sc_w_v = sc_w[...]
        # cat([codes, s]) @ W^T == codes @ Wt[:D] + s @ Wt[D:]   (Wt pre-transposed)
        codes = _mm(codes, sc_w_v[:d, :]) + _mm(s2, sc_w_v[d:, :]) + sc_b[...]
    else:
        codes = codes + s2
    assert idx == len(w_refs)                       # trace-time sanity check
    out_ref[...] = codes.reshape(b, n, d).astype(out_ref.dtype)


# ----------------------------- wrapper ---------------------------------------
def _stacked_spec(arr):
    """Block over the leading (style) axis only; squeeze it from the kernel view."""
    block = (None,) + tuple(arr.shape[1:])
    rest = arr.ndim - 1

    def idx(i, _r=rest):
        return (i,) + (0,) * _r

    return pl.BlockSpec(block, idx)


def style_attention_forward(z, s, params):
    """z, s: (B, set, n_styles, latent) -> (B, set, n_styles, latent)."""
    b, n, ns, d = z.shape
    s_t = jnp.transpose(s, (2, 0, 1, 3))            # (n_styles, B, N, D)
    z_t = jnp.transpose(z, (2, 0, 1, 3))
    inputs = [s_t, z_t] + list(params)
    out = pl.pallas_call(
        _style_kernel,
        grid=(ns,),
        in_specs=[_stacked_spec(a) for a in inputs],
        out_specs=pl.BlockSpec((None, b, n, d), lambda i: (i, 0, 0, 0)),
        out_shape=jax.ShapeDtypeStruct((ns, b, n, d), z.dtype),
        compiler_params=pltpu.CompilerParams(
            dimension_semantics=("parallel",)),     # style axis -> both TCs on v7x
    )(*inputs)
    return jnp.transpose(out, (1, 2, 0, 3))         # (B, N, n_styles, D)


# ----------------------------- parameter init --------------------------------
def _init_mab_params(key, d, hidden):
    ks = jax.random.split(key, 4)

    def w(k, din, dout):
        scale = 1.0 / math.sqrt(din)
        return (jax.random.normal(k, (din, dout), jnp.float32) * scale
                ).astype(jnp.bfloat16)              # pre-transposed (Din, Dout), bf16

    return [
        w(ks[0], d, 3 * d),                         # wqkv  (q|k|v concatenated)
        jnp.zeros((1, 3 * d), jnp.float32),         # bqkv
        w(ks[1], d, d),                             # wo
        jnp.zeros((1, d), jnp.float32),             # bo
        jnp.ones((1, d), jnp.float32),              # ln1 gamma
        jnp.zeros((1, d), jnp.float32),             # ln1 beta
        w(ks[2], d, hidden),                        # w1
        jnp.zeros((1, hidden), jnp.float32),        # b1
        w(ks[3], hidden, d),                        # w2
        jnp.zeros((1, d), jnp.float32),             # b2
        jnp.ones((1, d), jnp.float32),              # ln2 gamma
        jnp.zeros((1, d), jnp.float32),             # ln2 beta
    ]


def _init_style_params(key):
    ks = jax.random.split(key, 2 * ATTN_LAYERS + 2)
    flat = []
    for l in range(ATTN_LAYERS):
        if USE_SET_DECODER:
            flat += _init_mab_params(ks[2 * l], LATENT, FFN_HIDDEN)
        flat += _init_mab_params(ks[2 * l + 1], LATENT, FFN_HIDDEN)
    out_w = (jax.random.normal(ks[-2], (LATENT, LATENT), jnp.float32)
             / math.sqrt(LATENT)).astype(jnp.bfloat16)
    flat += [out_w, jnp.zeros((1, LATENT), jnp.float32)]
    if not DISABLE_STYLE_CONCAT:
        # torch: normal_(W[:, :style_dim], std=0.2); eye_(W[:, style_dim:]) with W (D, 2D).
        # Pre-transposed Wt (2D, D): rows [:style_dim] random, rows [style_dim:] identity.
        rand_t = jax.random.normal(ks[-1], (STYLE_DIM, LATENT), jnp.float32) * 0.2
        sc_w = jnp.concatenate([rand_t, jnp.eye(LATENT, dtype=jnp.float32)],
                               axis=0).astype(jnp.bfloat16)
        flat += [sc_w, jnp.zeros((1, LATENT), jnp.float32)]
    return flat


def init_params(key):
    keys = jax.random.split(key, N_STYLES)
    per_style = [_init_style_params(k) for k in keys]
    # stack each leaf over the style axis -> flat list of (N_STYLES, ...) arrays
    return [jnp.stack([ps[j] for ps in per_style], axis=0)
            for j in range(len(per_style[0]))]


# ----------------------------- main -------------------------------------------
if __name__ == "__main__":
    key = jax.random.PRNGKey(0)
    kz, ks_, kp = jax.random.split(key, 3)
    z = jax.random.normal(kz, (BATCH, SET_SIZE, N_STYLES, LATENT), jnp.float32)
    s = jax.random.normal(ks_, (BATCH, SET_SIZE, N_STYLES, LATENT), jnp.float32)
    params = init_params(kp)

    fwd = jax.jit(style_attention_forward)
    out = jax.block_until_ready(fwd(z, s, params))

    assert out.shape == (BATCH, SET_SIZE, N_STYLES, LATENT), out.shape
    assert bool(jnp.all(jnp.isfinite(out)))
    print("KERNEL_OK")
</pallas_src>

<mosaic_0001>
module attributes {stable_mosaic.version = 11 : i64} {
  func.func @_style_kernel(%arg0: i32, %arg1: memref<1x2x8x32xf32, #tpu.memory_space<vmem>>, %arg2: memref<1x2x8x32xf32, #tpu.memory_space<vmem>>, %arg3: memref<1x32x96xbf16, #tpu.memory_space<vmem>>, %arg4: memref<1x1x96xf32, #tpu.memory_space<vmem>>, %arg5: memref<1x32x32xbf16, #tpu.memory_space<vmem>>, %arg6: memref<1x1x32xf32, #tpu.memory_space<vmem>>, %arg7: memref<1x1x32xf32, #tpu.memory_space<vmem>>, %arg8: memref<1x1x32xf32, #tpu.memory_space<vmem>>, %arg9: memref<1x32x64xbf16, #tpu.memory_space<vmem>>, %arg10: memref<1x1x64xf32, #tpu.memory_space<vmem>>, %arg11: memref<1x64x32xbf16, #tpu.memory_space<vmem>>, %arg12: memref<1x1x32xf32, #tpu.memory_space<vmem>>, %arg13: memref<1x1x32xf32, #tpu.memory_space<vmem>>, %arg14: memref<1x1x32xf32, #tpu.memory_space<vmem>>, %arg15: memref<1x32x96xbf16, #tpu.memory_space<vmem>>, %arg16: memref<1x1x96xf32, #tpu.memory_space<vmem>>, %arg17: memref<1x32x32xbf16, #tpu.memory_space<vmem>>, %arg18: memref<1x1x32xf32, #tpu.memory_space<vmem>>, %arg19: memref<1x1x32xf32, #tpu.memory_space<vmem>>, %arg20: memref<1x1x32xf32, #tpu.memory_space<vmem>>, %arg21: memref<1x32x64xbf16, #tpu.memory_space<vmem>>, %arg22: memref<1x1x64xf32, #tpu.memory_space<vmem>>, %arg23: memref<1x64x32xbf16, #tpu.memory_space<vmem>>, %arg24: memref<1x1x32xf32, #tpu.memory_space<vmem>>, %arg25: memref<1x1x32xf32, #tpu.memory_space<vmem>>, %arg26: memref<1x1x32xf32, #tpu.memory_space<vmem>>, %arg27: memref<1x32x32xbf16, #tpu.memory_space<vmem>>, %arg28: memref<1x1x32xf32, #tpu.memory_space<vmem>>, %arg29: memref<1x64x32xbf16, #tpu.memory_space<vmem>>, %arg30: memref<1x1x32xf32, #tpu.memory_space<vmem>>, %arg31: memref<1x2x8x32xf32, #tpu.memory_space<vmem>>) attributes {dimension_semantics = [#tpu.dimension_semantics<parallel>], iteration_bounds = array<i64: 3>, scalar_prefetch = 0 : i64, scratch_operands = 0 : i64, tpu.core_type = #tpu.core_type<tc>, window_params = [{transform_indices = @transform_0, window_bounds = array<i64: 1, 2, 8, 32>}, {transform_indices = @transform_1, window_bounds = array<i64: 1, 2, 8, 32>}, {transform_indices = @transform_2, window_bounds = array<i64: 1, 32, 96>}, {transform_indices = @transform_3, window_bounds = array<i64: 1, 1, 96>}, {transform_indices = @transform_4, window_bounds = array<i64: 1, 32, 32>}, {transform_indices = @transform_5, window_bounds = array<i64: 1, 1, 32>}, {transform_indices = @transform_6, window_bounds = array<i64: 1, 1, 32>}, {transform_indices = @transform_7, window_bounds = array<i64: 1, 1, 32>}, {transform_indices = @transform_8, window_bounds = array<i64: 1, 32, 64>}, {transform_indices = @transform_9, window_bounds = array<i64: 1, 1, 64>}, {transform_indices = @transform_10, window_bounds = array<i64: 1, 64, 32>}, {transform_indices = @transform_11, window_bounds = array<i64: 1, 1, 32>}, {transform_indices = @transform_12, window_bounds = array<i64: 1, 1, 32>}, {transform_indices = @transform_13, window_bounds = array<i64: 1, 1, 32>}, {transform_indices = @transform_14, window_bounds = array<i64: 1, 32, 96>}, {transform_indices = @transform_15, window_bounds = array<i64: 1, 1, 96>}, {transform_indices = @transform_16, window_bounds = array<i64: 1, 32, 32>}, {transform_indices = @transform_17, window_bounds = array<i64: 1, 1, 32>}, {transform_indices = @transform_18, window_bounds = array<i64: 1, 1, 32>}, {transform_indices = @transform_19, window_bounds = array<i64: 1, 1, 32>}, {transform_indices = @transform_20, window_bounds = array<i64: 1, 32, 64>}, {transform_indices = @transform_21, window_bounds = array<i64: 1, 1, 64>}, {transform_indices = @transform_22, window_bounds = array<i64: 1, 64, 32>}, {transform_indices = @transform_23, window_bounds = array<i64: 1, 1, 32>}, {transform_indices = @transform_24, window_bounds = array<i64: 1, 1, 32>}, {transform_indices = @transform_25, window_bounds = array<i64: 1, 1, 32>}, {transform_indices = @transform_26, window_bounds = array<i64: 1, 32, 32>}, {transform_indices = @transform_27, window_bounds = array<i64: 1, 1, 32>}, {transform_indices = @transform_28, window_bounds = array<i64: 1, 64, 32>}, {transform_indices = @transform_29, window_bounds = array<i64: 1, 1, 32>}, {transform_indices = @transform_30, window_bounds = array<i64: 1, 2, 8, 32>}]} {
    %c0 = arith.constant 0 : index
    %c0_0 = arith.constant 0 : index
    %c0_1 = arith.constant 0 : index
    %c0_2 = arith.constant 0 : index
    %0 = vector.load %arg1[%c0, %c0_0, %c0_1, %c0_2] : memref<1x2x8x32xf32, #tpu.memory_space<vmem>>, vector<1x2x8x32xf32>
    %1 = vector.shape_cast %0 : vector<1x2x8x32xf32> to vector<2x8x32xf32>
    %2 = vector.shape_cast %1 : vector<2x8x32xf32> to vector<16x32xf32>
    %c0_3 = arith.constant 0 : index
    %c0_4 = arith.constant 0 : index
    %c0_5 = arith.constant 0 : index
    %c0_6 = arith.constant 0 : index
    %3 = vector.load %arg2[%c0_3, %c0_4, %c0_5, %c0_6] : memref<1x2x8x32xf32, #tpu.memory_space<vmem>>, vector<1x2x8x32xf32>
    %4 = vector.shape_cast %3 : vector<1x2x8x32xf32> to vector<2x8x32xf32>
    %5 = vector.shape_cast %4 : vector<2x8x32xf32> to vector<16x32xf32>
    %c0_7 = arith.constant 0 : index
    %c0_8 = arith.constant 0 : index
    %c0_9 = arith.constant 0 : index
    %6 = vector.load %arg3[%c0_7, %c0_8, %c0_9] : memref<1x32x96xbf16, #tpu.memory_space<vmem>>, vector<1x32x96xbf16>
    %7 = vector.shape_cast %6 : vector<1x32x96xbf16> to vector<32x96xbf16>
    %c0_10 = arith.constant 0 : index
    %c0_11 = arith.constant 0 : index
    %c0_12 = arith.constant 0 : index
    %8 = vector.load %arg4[%c0_10, %c0_11, %c0_12] : memref<1x1x96xf32, #tpu.memory_space<vmem>>, vector<1x1x96xf32>
    %9 = vector.shape_cast %8 : vector<1x1x96xf32> to vector<1x96xf32>
    %10 = arith.truncf %2 : vector<16x32xf32> to vector<16x32xbf16>
    %cst = arith.constant dense<0.000000e+00> : vector<16x96xf32>
    %11 = tpu.matmul %10, %7, %cst {dimension_numbers = #tpu.dot_dimension_numbers<[1], [0], [0], [1], [0, 0, 1, 1], [], []>} : vector<16x32xbf16>, vector<32x96xbf16>, vector<16x96xf32> -> vector<16x96xf32>
    %12 = vector.broadcast %9 : vector<1x96xf32> to vector<16x96xf32>
    %13 = arith.addf %11, %12 : vector<16x96xf32>
    %14 = vector.extract_strided_slice %13 {offsets = [0, 0], sizes = [16, 32], strides = [1, 1]} : vector<16x96xf32> to vector<16x32xf32>
    %15 = vector.extract_strided_slice %13 {offsets = [0, 32], sizes = [16, 32], strides = [1, 1]} : vector<16x96xf32> to vector<16x32xf32>
    %16 = vector.extract_strided_slice %13 {offsets = [0, 64], sizes = [16, 32], strides = [1, 1]} : vector<16x96xf32> to vector<16x32xf32>
    %17 = vector.shape_cast %14 : vector<16x32xf32> to vector<2x8x32xf32>
    %18 = arith.truncf %17 : vector<2x8x32xf32> to vector<2x8x32xbf16>
    %19 = vector.shape_cast %15 : vector<16x32xf32> to vector<2x8x32xf32>
    %20 = arith.truncf %19 : vector<2x8x32xf32> to vector<2x8x32xbf16>
    %21 = vector.shape_cast %16 : vector<16x32xf32> to vector<2x8x32xf32>
    %22 = arith.truncf %21 : vector<2x8x32xf32> to vector<2x8x32xbf16>
    %23 = vector.extract_strided_slice %18 {offsets = [0, 0, 0], sizes = [2, 8, 8], strides = [1, 1, 1]} : vector<2x8x32xbf16> to vector<2x8x8xbf16>
    %24 = vector.extract_strided_slice %20 {offsets = [0, 0, 0], sizes = [2, 8, 8], strides = [1, 1, 1]} : vector<2x8x32xbf16> to vector<2x8x8xbf16>
    %25 = vector.extract_strided_slice %22 {offsets = [0, 0, 0], sizes = [2, 8, 8], strides = [1, 1, 1]} : vector<2x8x32xbf16> to vector<2x8x8xbf16>
    "tpu.trace_start"() <{level = 10 : i32, message = "bqd,bkd->bqk"}> : () -> ()
    %cst_13 = arith.constant dense<0.000000e+00> : vector<2x8x8xf32>
    %26 = tpu.matmul %23, %24, %cst_13 {dimension_numbers = #tpu.dot_dimension_numbers<[2], [2], [1], [1], [0, 0, 0, 1, 1, 1], [0], [0]>} : vector<2x8x8xbf16>, vector<2x8x8xbf16>, vector<2x8x8xf32> -> vector<2x8x8xf32>
    "tpu.trace_stop"() : () -> ()
    %cst_14 = arith.constant 0.353553385 : f32
    %27 = vector.broadcast %cst_14 : f32 to vector<2x8x8xf32>
    %28 = arith.mulf %26, %27 : vector<2x8x8xf32>
    %cst_15 = arith.constant dense<0xFF800000> : vector<2x8xf32>
    %29 = vector.multi_reduction <maximumf>, %28, %cst_15 [2] : vector<2x8x8xf32> to vector<2x8xf32>
    %30 = vector.shape_cast %29 : vector<2x8xf32> to vector<2x8x1xf32>
    %31 = vector.broadcast %30 : vector<2x8x1xf32> to vector<2x8x8xf32>
    %32 = arith.subf %28, %31 : vector<2x8x8xf32>
    %33 = math.exp %32 : vector<2x8x8xf32>
    %cst_16 = arith.constant dense<0.000000e+00> : vector<2x8xf32>
    %34 = vector.multi_reduction <add>, %33, %cst_16 [2] : vector<2x8x8xf32> to vector<2x8xf32>
    %35 = vector.shape_cast %34 : vector<2x8xf32> to vector<2x8x1xf32>
    %36 = tpu.reciprocal %35 {approx = true} : vector<2x8x1xf32> -> vector<2x8x1xf32>
    %37 = vector.broadcast %36 : vector<2x8x1xf32> to vector<2x8x8xf32>
    %38 = arith.mulf %33, %37 : vector<2x8x8xf32>
    %39 = arith.truncf %38 : vector<2x8x8xf32> to vector<2x8x8xbf16>
    "tpu.trace_start"() <{level = 10 : i32, message = "bqk,bkd->bqd"}> : () -> ()
    %cst_17 = arith.constant dense<0.000000e+00> : vector<2x8x8xf32>
    %40 = tpu.matmul %39, %25, %cst_17 {dimension_numbers = #tpu.dot_dimension_numbers<[2], [1], [1], [2], [0, 0, 0, 1, 1, 2], [0], [0]>} : vector<2x8x8xbf16>, vector<2x8x8xbf16>, vector<2x8x8xf32> -> vector<2x8x8xf32>
    "tpu.trace_stop"() : () -> ()
    %41 = vector.extract_strided_slice %18 {offsets = [0, 0, 8], sizes = [2, 8, 8], strides = [1, 1, 1]} : vector<2x8x32xbf16> to vector<2x8x8xbf16>
    %42 = vector.extract_strided_slice %20 {offsets = [0, 0, 8], sizes = [2, 8, 8], strides = [1, 1, 1]} : vector<2x8x32xbf16> to vector<2x8x8xbf16>
    %43 = vector.extract_strided_slice %22 {offsets = [0, 0, 8], sizes = [2, 8, 8], strides = [1, 1, 1]} : vector<2x8x32xbf16> to vector<2x8x8xbf16>
    "tpu.trace_start"() <{level = 10 : i32, message = "bqd,bkd->bqk"}> : () -> ()
    %cst_18 = arith.constant dense<0.000000e+00> : vector<2x8x8xf32>
    %44 = tpu.matmul %41, %42, %cst_18 {dimension_numbers = #tpu.dot_dimension_numbers<[2], [2], [1], [1], [0, 0, 0, 1, 1, 1], [0], [0]>} : vector<2x8x8xbf16>, vector<2x8x8xbf16>, vector<2x8x8xf32> -> vector<2x8x8xf32>
    "tpu.trace_stop"() : () -> ()
    %cst_19 = arith.constant 0.353553385 : f32
    %45 = vector.broadcast %cst_19 : f32 to vector<2x8x8xf32>
    %46 = arith.mulf %44, %45 : vector<2x8x8xf32>
    %cst_20 = arith.constant dense<0xFF800000> : vector<2x8xf32>
    %47 = vector.multi_reduction <maximumf>, %46, %cst_20 [2] : vector<2x8x8xf32> to vector<2x8xf32>
    %48 = vector.shape_cast %47 : vector<2x8xf32> to vector<2x8x1xf32>
    %49 = vector.broadcast %48 : vector<2x8x1xf32> to vector<2x8x8xf32>
    %50 = arith.subf %46, %49 : vector<2x8x8xf32>
    %51 = math.exp %50 : vector<2x8x8xf32>
    %cst_21 = arith.constant dense<0.000000e+00> : vector<2x8xf32>
    %52 = vector.multi_reduction <add>, %51, %cst_21 [2] : vector<2x8x8xf32> to vector<2x8xf32>
    %53 = vector.shape_cast %52 : vector<2x8xf32> to vector<2x8x1xf32>
    %54 = tpu.reciprocal %53 {approx = true} : vector<2x8x1xf32> -> vector<2x8x1xf32>
    %55 = vector.broadcast %54 : vector<2x8x1xf32> to vector<2x8x8xf32>
    %56 = arith.mulf %51, %55 : vector<2x8x8xf32>
    %57 = arith.truncf %56 : vector<2x8x8xf32> to vector<2x8x8xbf16>
    "tpu.trace_start"() <{level = 10 : i32, message = "bqk,bkd->bqd"}> : () -> ()
    %cst_22 = arith.constant dense<0.000000e+00> : vector<2x8x8xf32>
    %58 = tpu.matmul %57, %43, %cst_22 {dimension_numbers = #tpu.dot_dimension_numbers<[2], [1], [1], [2], [0, 0, 0, 1, 1, 2], [0], [0]>} : vector<2x8x8xbf16>, vector<2x8x8xbf16>, vector<2x8x8xf32> -> vector<2x8x8xf32>
    "tpu.trace_stop"() : () -> ()
    %59 = vector.extract_strided_slice %18 {offsets = [0, 0, 16], sizes = [2, 8, 8], strides = [1, 1, 1]} : vector<2x8x32xbf16> to vector<2x8x8xbf16>
    %60 = vector.extract_strided_slice %20 {offsets = [0, 0, 16], sizes = [2, 8, 8], strides = [1, 1, 1]} : vector<2x8x32xbf16> to vector<2x8x8xbf16>
    %61 = vector.extract_strided_slice %22 {offsets = [0, 0, 16], sizes = [2, 8, 8], strides = [1, 1, 1]} : vector<2x8x32xbf16> to vector<2x8x8xbf16>
    "tpu.trace_start"() <{level = 10 : i32, message = "bqd,bkd->bqk"}> : () -> ()
    %cst_23 = arith.constant dense<0.000000e+00> : vector<2x8x8xf32>
    %62 = tpu.matmul %59, %60, %cst_23 {dimension_numbers = #tpu.dot_dimension_numbers<[2], [2], [1], [1], [0, 0, 0, 1, 1, 1], [0], [0]>} : vector<2x8x8xbf16>, vector<2x8x8xbf16>, vector<2x8x8xf32> -> vector<2x8x8xf32>
    "tpu.trace_stop"() : () -> ()
    %cst_24 = arith.constant 0.353553385 : f32
    %63 = vector.broadcast %cst_24 : f32 to vector<2x8x8xf32>
    %64 = arith.mulf %62, %63 : vector<2x8x8xf32>
    %cst_25 = arith.constant dense<0xFF800000> : vector<2x8xf32>
    %65 = vector.multi_reduction <maximumf>, %64, %cst_25 [2] : vector<2x8x8xf32> to vector<2x8xf32>
    %66 = vector.shape_cast %65 : vector<2x8xf32> to vector<2x8x1xf32>
    %67 = vector.broadcast %66 : vector<2x8x1xf32> to vector<2x8x8xf32>
    %68 = arith.subf %64, %67 : vector<2x8x8xf32>
    %69 = math.exp %68 : vector<2x8x8xf32>
    %cst_26 = arith.constant dense<0.000000e+00> : vector<2x8xf32>
    %70 = vector.multi_reduction <add>, %69, %cst_26 [2] : vector<2x8x8xf32> to vector<2x8xf32>
    %71 = vector.shape_cast %70 : vector<2x8xf32> to vector<2x8x1xf32>
    %72 = tpu.reciprocal %71 {approx = true} : vector<2x8x1xf32> -> vector<2x8x1xf32>
    %73 = vector.broadcast %72 : vector<2x8x1xf32> to vector<2x8x8xf32>
    %74 = arith.mulf %69, %73 : vector<2x8x8xf32>
    %75 = arith.truncf %74 : vector<2x8x8xf32> to vector<2x8x8xbf16>
    "tpu.trace_start"() <{level = 10 : i32, message = "bqk,bkd->bqd"}> : () -> ()
    %cst_27 = arith.constant dense<0.000000e+00> : vector<2x8x8xf32>
    %76 = tpu.matmul %75, %61, %cst_27 {dimension_numbers = #tpu.dot_dimension_numbers<[2], [1], [1], [2], [0, 0, 0, 1, 1, 2], [0], [0]>} : vector<2x8x8xbf16>, vector<2x8x8xbf16>, vector<2x8x8xf32> -> vector<2x8x8xf32>
    "tpu.trace_stop"() : () -> ()
    %77 = vector.extract_strided_slice %18 {offsets = [0, 0, 24], sizes = [2, 8, 8], strides = [1, 1, 1]} : vector<2x8x32xbf16> to vector<2x8x8xbf16>
    %78 = vector.extract_strided_slice %20 {offsets = [0, 0, 24], sizes = [2, 8, 8], strides = [1, 1, 1]} : vector<2x8x32xbf16> to vector<2x8x8xbf16>
    %79 = vector.extract_strided_slice %22 {offsets = [0, 0, 24], sizes = [2, 8, 8], strides = [1, 1, 1]} : vector<2x8x32xbf16> to vector<2x8x8xbf16>
    "tpu.trace_start"() <{level = 10 : i32, message = "bqd,bkd->bqk"}> : () -> ()
    %cst_28 = arith.constant dense<0.000000e+00> : vector<2x8x8xf32>
    %80 = tpu.matmul %77, %78, %cst_28 {dimension_numbers = #tpu.dot_dimension_numbers<[2], [2], [1], [1], [0, 0, 0, 1, 1, 1], [0], [0]>} : vector<2x8x8xbf16>, vector<2x8x8xbf16>, vector<2x8x8xf32> -> vector<2x8x8xf32>
    "tpu.trace_stop"() : () -> ()
    %cst_29 = arith.constant 0.353553385 : f32
    %81 = vector.broadcast %cst_29 : f32 to vector<2x8x8xf32>
    %82 = arith.mulf %80, %81 : vector<2x8x8xf32>
    %cst_30 = arith.constant dense<0xFF800000> : vector<2x8xf32>
    %83 = vector.multi_reduction <maximumf>, %82, %cst_30 [2] : vector<2x8x8xf32> to vector<2x8xf32>
    %84 = vector.shape_cast %83 : vector<2x8xf32> to vector<2x8x1xf32>
    %85 = vector.broadcast %84 : vector<2x8x1xf32> to vector<2x8x8xf32>
    %86 = arith.subf %82, %85 : vector<2x8x8xf32>
    %87 = math.exp %86 : vector<2x8x8xf32>
    %cst_31 = arith.constant dense<0.000000e+00> : vector<2x8xf32>
    %88 = vector.multi_reduction <add>, %87, %cst_31 [2] : vector<2x8x8xf32> to vector<2x8xf32>
    %89 = vector.shape_cast %88 : vector<2x8xf32> to vector<2x8x1xf32>
    %90 = tpu.reciprocal %89 {approx = true} : vector<2x8x1xf32> -> vector<2x8x1xf32>
    %91 = vector.broadcast %90 : vector<2x8x1xf32> to vector<2x8x8xf32>
    %92 = arith.mulf %87, %91 : vector<2x8x8xf32>
    %93 = arith.truncf %92 : vector<2x8x8xf32> to vector<2x8x8xbf16>
    "tpu.trace_start"() <{level = 10 : i32, message = "bqk,bkd->bqd"}> : () -> ()
    %cst_32 = arith.constant dense<0.000000e+00> : vector<2x8x8xf32>
    %94 = tpu.matmul %93, %79, %cst_32 {dimension_numbers = #tpu.dot_dimension_numbers<[2], [1], [1], [2], [0, 0, 0, 1, 1, 2], [0], [0]>} : vector<2x8x8xbf16>, vector<2x8x8xbf16>, vector<2x8x8xf32> -> vector<2x8x8xf32>
    "tpu.trace_stop"() : () -> ()
    %95 = tpu.concatenate %40, %58, %76, %94 in 2 : vector<2x8x8xf32>, vector<2x8x8xf32>, vector<2x8x8xf32>, vector<2x8x8xf32> -> vector<2x8x32xf32>
    %96 = vector.shape_cast %95 : vector<2x8x32xf32> to vector<16x32xf32>
    %c0_33 = arith.constant 0 : index
    %c0_34 = arith.constant 0 : index
    %c0_35 = arith.constant 0 : index
    %97 = vector.load %arg5[%c0_33, %c0_34, %c0_35] : memref<1x32x32xbf16, #tpu.memory_space<vmem>>, vector<1x32x32xbf16>
    %98 = vector.shape_cast %97 : vector<1x32x32xbf16> to vector<32x32xbf16>
    %99 = arith.truncf %96 : vector<16x32xf32> to vector<16x32xbf16>
    %cst_36 = arith.constant dense<0.000000e+00> : vector<16x32xf32>
    %100 = tpu.matmul %99, %98, %cst_36 {dimension_numbers = #tpu.dot_dimension_numbers<[1], [0], [0], [1], [0, 0, 1, 1], [], []>} : vector<16x32xbf16>, vector<32x32xbf16>, vector<16x32xf32> -> vector<16x32xf32>
    %c0_37 = arith.constant 0 : index
    %c0_38 = arith.constant 0 : index
    %c0_39 = arith.constant 0 : index
    %101 = vector.load %arg6[%c0_37, %c0_38, %c0_39] : memref<1x1x32xf32, #tpu.memory_space<vmem>>, vector<1x1x32xf32>
    %102 = vector.shape_cast %101 : vector<1x1x32xf32> to vector<1x32xf32>
    %103 = vector.broadcast %102 : vector<1x32xf32> to vector<16x32xf32>
    %104 = arith.addf %100, %103 : vector<16x32xf32>
    %105 = arith.addf %2, %104 : vector<16x32xf32>
    %cst_40 = arith.constant dense<0.000000e+00> : vector<16xf32>
    %106 = vector.multi_reduction <add>, %105, %cst_40 [1] : vector<16x32xf32> to vector<16xf32>
    %107 = vector.shape_cast %106 : vector<16xf32> to vector<16x1xf32>
    %cst_41 = arith.constant 3.200000e+01 : f32
    %108 = vector.broadcast %cst_41 : f32 to vector<16x1xf32>
    %109 = arith.divf %107, %108 : vector<16x1xf32>
    %110 = vector.broadcast %109 : vector<16x1xf32> to vector<16x32xf32>
    %111 = arith.subf %105, %110 : vector<16x32xf32>
    %112 = arith.mulf %111, %111 : vector<16x32xf32>
    %cst_42 = arith.constant dense<0.000000e+00> : vector<16xf32>
    %113 = vector.multi_reduction <add>, %112, %cst_42 [1] : vector<16x32xf32> to vector<16xf32>
    %114 = vector.shape_cast %113 : vector<16xf32> to vector<16x1xf32>
    %cst_43 = arith.constant 3.200000e+01 : f32
    %115 = vector.broadcast %cst_43 : f32 to vector<16x1xf32>
    %116 = arith.divf %114, %115 : vector<16x1xf32>
    %117 = vector.broadcast %109 : vector<16x1xf32> to vector<16x32xf32>
    %118 = arith.subf %105, %117 : vector<16x32xf32>
    %cst_44 = arith.constant 9.99999974E-6 : f32
    %119 = vector.broadcast %cst_44 : f32 to vector<16x1xf32>
    %120 = arith.addf %116, %119 : vector<16x1xf32>
    %121 = math.rsqrt %120 : vector<16x1xf32>
    %122 = vector.broadcast %121 : vector<16x1xf32> to vector<16x32xf32>
    %123 = arith.mulf %118, %122 : vector<16x32xf32>
    %c0_45 = arith.constant 0 : index
    %c0_46 = arith.constant 0 : index
    %c0_47 = arith.constant 0 : index
    %124 = vector.load %arg7[%c0_45, %c0_46, %c0_47] : memref<1x1x32xf32, #tpu.memory_space<vmem>>, vector<1x1x32xf32>
    %125 = vector.shape_cast %124 : vector<1x1x32xf32> to vector<1x32xf32>
    %126 = vector.broadcast %125 : vector<1x32xf32> to vector<16x32xf32>
    %127 = arith.mulf %123, %126 : vector<16x32xf32>
    %c0_48 = arith.constant 0 : index
    %c0_49 = arith.constant 0 : index
    %c0_50 = arith.constant 0 : index
    %128 = vector.load %arg8[%c0_48, %c0_49, %c0_50] : memref<1x1x32xf32, #tpu.memory_space<vmem>>, vector<1x1x32xf32>
    %129 = vector.shape_cast %128 : vector<1x1x32xf32> to vector<1x32xf32>
    %130 = vector.broadcast %129 : vector<1x32xf32> to vector<16x32xf32>
    %131 = arith.addf %127, %130 : vector<16x32xf32>
    %c0_51 = arith.constant 0 : index
    %c0_52 = arith.constant 0 : index
    %c0_53 = arith.constant 0 : index
    %132 = vector.load %arg9[%c0_51, %c0_52, %c0_53] : memref<1x32x64xbf16, #tpu.memory_space<vmem>>, vector<1x32x64xbf16>
    %133 = vector.shape_cast %132 : vector<1x32x64xbf16> to vector<32x64xbf16>
    %134 = arith.truncf %131 : vector<16x32xf32> to vector<16x32xbf16>
    %cst_54 = arith.constant dense<0.000000e+00> : vector<16x64xf32>
    %135 = tpu.matmul %134, %133, %cst_54 {dimension_numbers = #tpu.dot_dimension_numbers<[1], [0], [0], [1], [0, 0, 1, 1], [], []>} : vector<16x32xbf16>, vector<32x64xbf16>, vector<16x64xf32> -> vector<16x64xf32>
    %c0_55 = arith.constant 0 : index
    %c0_56 = arith.constant 0 : index
    %c0_57 = arith.constant 0 : index
    %136 = vector.load %arg10[%c0_55, %c0_56, %c0_57] : memref<1x1x64xf32, #tpu.memory_space<vmem>>, vector<1x1x64xf32>
    %137 = vector.shape_cast %136 : vector<1x1x64xf32> to vector<1x64xf32>
    %138 = vector.broadcast %137 : vector<1x64xf32> to vector<16x64xf32>
    %139 = arith.addf %135, %138 : vector<16x64xf32>
    %cst_58 = arith.constant 0.000000e+00 : f32
    %140 = vector.broadcast %cst_58 : f32 to vector<16x64xf32>
    %141 = arith.cmpf oge, %139, %140 : vector<16x64xf32>
    %cst_59 = arith.constant 0.00999999977 : f32
    %142 = vector.broadcast %cst_59 : f32 to vector<16x64xf32>
    %143 = arith.mulf %142, %139 : vector<16x64xf32>
    %144 = arith.select %141, %139, %143 : vector<16x64xi1>, vector<16x64xf32>
    %c0_60 = arith.constant 0 : index
    %c0_61 = arith.constant 0 : index
    %c0_62 = arith.constant 0 : index
    %145 = vector.load %arg11[%c0_60, %c0_61, %c0_62] : memref<1x64x32xbf16, #tpu.memory_space<vmem>>, vector<1x64x32xbf16>
    %146 = vector.shape_cast %145 : vector<1x64x32xbf16> to vector<64x32xbf16>
    %147 = arith.truncf %144 : vector<16x64xf32> to vector<16x64xbf16>
    %cst_63 = arith.constant dense<0.000000e+00> : vector<16x32xf32>
    %148 = tpu.matmul %147, %146, %cst_63 {dimension_numbers = #tpu.dot_dimension_numbers<[1], [0], [0], [1], [0, 0, 1, 1], [], []>} : vector<16x64xbf16>, vector<64x32xbf16>, vector<16x32xf32> -> vector<16x32xf32>
    %c0_64 = arith.constant 0 : index
    %c0_65 = arith.constant 0 : index
    %c0_66 = arith.constant 0 : index
    %149 = vector.load %arg12[%c0_64, %c0_65, %c0_66] : memref<1x1x32xf32, #tpu.memory_space<vmem>>, vector<1x1x32xf32>
    %150 = vector.shape_cast %149 : vector<1x1x32xf32> to vector<1x32xf32>
    %151 = vector.broadcast %150 : vector<1x32xf32> to vector<16x32xf32>
    %152 = arith.addf %148, %151 : vector<16x32xf32>
    %153 = arith.addf %131, %152 : vector<16x32xf32>
    %cst_67 = arith.constant dense<0.000000e+00> : vector<16xf32>
    %154 = vector.multi_reduction <add>, %153, %cst_67 [1] : vector<16x32xf32> to vector<16xf32>
    %155 = vector.shape_cast %154 : vector<16xf32> to vector<16x1xf32>
    %cst_68 = arith.constant 3.200000e+01 : f32
    %156 = vector.broadcast %cst_68 : f32 to vector<16x1xf32>
    %157 = arith.divf %155, %156 : vector<16x1xf32>
    %158 = vector.broadcast %157 : vector<16x1xf32> to vector<16x32xf32>
    %159 = arith.subf %153, %158 : vector<16x32xf32>
    %160 = arith.mulf %159, %159 : vector<16x32xf32>
    %cst_69 = arith.constant dense<0.000000e+00> : vector<16xf32>
    %161 = vector.multi_reduction <add>, %160, %cst_69 [1] : vector<16x32xf32> to vector<16xf32>
    %162 = vector.shape_cast %161 : vector<16xf32> to vector<16x1xf32>
    %cst_70 = arith.constant 3.200000e+01 : f32
    %163 = vector.broadcast %cst_70 : f32 to vector<16x1xf32>
    %164 = arith.divf %162, %163 : vector<16x1xf32>
    %165 = vector.broadcast %157 : vector<16x1xf32> to vector<16x32xf32>
    %166 = arith.subf %153, %165 : vector<16x32xf32>
    %cst_71 = arith.constant 9.99999974E-6 : f32
    %167 = vector.broadcast %cst_71 : f32 to vector<16x1xf32>
    %168 = arith.addf %164, %167 : vector<16x1xf32>
    %169 = math.rsqrt %168 : vector<16x1xf32>
    %170 = vector.broadcast %169 : vector<16x1xf32> to vector<16x32xf32>
    %171 = arith.mulf %166, %170 : vector<16x32xf32>
    %c0_72 = arith.constant 0 : index
    %c0_73 = arith.constant 0 : index
    %c0_74 = arith.constant 0 : index
    %172 = vector.load %arg13[%c0_72, %c0_73, %c0_74] : memref<1x1x32xf32, #tpu.memory_space<vmem>>, vector<1x1x32xf32>
    %173 = vector.shape_cast %172 : vector<1x1x32xf32> to vector<1x32xf32>
    %174 = vector.broadcast %173 : vector<1x32xf32> to vector<16x32xf32>
    %175 = arith.mulf %171, %174 : vector<16x32xf32>
    %c0_75 = arith.constant 0 : index
    %c0_76 = arith.constant 0 : index
    %c0_77 = arith.constant 0 : index
    %176 = vector.load %arg14[%c0_75, %c0_76, %c0_77] : memref<1x1x32xf32, #tpu.memory_space<vmem>>, vector<1x1x32xf32>
    %177 = vector.shape_cast %176 : vector<1x1x32xf32> to vector<1x32xf32>
    %178 = vector.broadcast %177 : vector<1x32xf32> to vector<16x32xf32>
    %179 = arith.addf %175, %178 : vector<16x32xf32>
    %c0_78 = arith.constant 0 : index
    %c0_79 = arith.constant 0 : index
    %c0_80 = arith.constant 0 : index
    %180 = vector.load %arg15[%c0_78, %c0_79, %c0_80] : memref<1x32x96xbf16, #tpu.memory_space<vmem>>, vector<1x32x96xbf16>
    %181 = vector.shape_cast %180 : vector<1x32x96xbf16> to vector<32x96xbf16>
    %c0_81 = arith.constant 0 : index
    %c0_82 = arith.constant 0 : index
    %c0_83 = arith.constant 0 : index
    %182 = vector.load %arg16[%c0_81, %c0_82, %c0_83] : memref<1x1x96xf32, #tpu.memory_space<vmem>>, vector<1x1x96xf32>
    %183 = vector.shape_cast %182 : vector<1x1x96xf32> to vector<1x96xf32>
    %184 = vector.extract_strided_slice %181 {offsets = [0, 0], sizes = [32, 32], strides = [1, 1]} : vector<32x96xbf16> to vector<32x32xbf16>
    %185 = arith.truncf %179 : vector<16x32xf32> to vector<16x32xbf16>
    %cst_84 = arith.constant dense<0.000000e+00> : vector<16x32xf32>
    %186 = tpu.matmul %185, %184, %cst_84 {dimension_numbers = #tpu.dot_dimension_numbers<[1], [0], [0], [1], [0, 0, 1, 1], [], []>} : vector<16x32xbf16>, vector<32x32xbf16>, vector<16x32xf32> -> vector<16x32xf32>
    %187 = vector.extract_strided_slice %183 {offsets = [0, 0], sizes = [1, 32], strides = [1, 1]} : vector<1x96xf32> to vector<1x32xf32>
    %188 = vector.broadcast %187 : vector<1x32xf32> to vector<16x32xf32>
    %189 = arith.addf %186, %188 : vector<16x32xf32>
    %190 = vector.extract_strided_slice %181 {offsets = [0, 32], sizes = [32, 64], strides = [1, 1]} : vector<32x96xbf16> to vector<32x64xbf16>
    %191 = arith.truncf %5 : vector<16x32xf32> to vector<16x32xbf16>
    %cst_85 = arith.constant dense<0.000000e+00> : vector<16x64xf32>
    %192 = tpu.matmul %191, %190, %cst_85 {dimension_numbers = #tpu.dot_dimension_numbers<[1], [0], [0], [1], [0, 0, 1, 1], [], []>} : vector<16x32xbf16>, vector<32x64xbf16>, vector<16x64xf32> -> vector<16x64xf32>
    %193 = vector.extract_strided_slice %183 {offsets = [0, 32], sizes = [1, 64], strides = [1, 1]} : vector<1x96xf32> to vector<1x64xf32>
    %194 = vector.broadcast %193 : vector<1x64xf32> to vector<16x64xf32>
    %195 = arith.addf %192, %194 : vector<16x64xf32>
    %196 = vector.extract_strided_slice %195 {offsets = [0, 0], sizes = [16, 32], strides = [1, 1]} : vector<16x64xf32> to vector<16x32xf32>
    %197 = vector.extract_strided_slice %195 {offsets = [0, 32], sizes = [16, 32], strides = [1, 1]} : vector<16x64xf32> to vector<16x32xf32>
    %198 = vector.shape_cast %189 : vector<16x32xf32> to vector<2x8x32xf32>
    %199 = arith.truncf %198 : vector<2x8x32xf32> to vector<2x8x32xbf16>
    %200 = vector.shape_cast %196 : vector<16x32xf32> to vector<2x8x32xf32>
    %201 = arith.truncf %200 : vector<2x8x32xf32> to vector<2x8x32xbf16>
    %202 = vector.shape_cast %197 : vector<16x32xf32> to vector<2x8x32xf32>
    %203 = arith.truncf %202 : vector<2x8x32xf32> to vector<2x8x32xbf16>
    %204 = vector.extract_strided_slice %199 {offsets = [0, 0, 0], sizes = [2, 8, 8], strides = [1, 1, 1]} : vector<2x8x32xbf16> to vector<2x8x8xbf16>
    %205 = vector.extract_strided_slice %201 {offsets = [0, 0, 0], sizes = [2, 8, 8], strides = [1, 1, 1]} : vector<2x8x32xbf16> to vector<2x8x8xbf16>
    %206 = vector.extract_strided_slice %203 {offsets = [0, 0, 0], sizes = [2, 8, 8], strides = [1, 1, 1]} : vector<2x8x32xbf16> to vector<2x8x8xbf16>
    "tpu.trace_start"() <{level = 10 : i32, message = "bqd,bkd->bqk"}> : () -> ()
    %cst_86 = arith.constant dense<0.000000e+00> : vector<2x8x8xf32>
    %207 = tpu.matmul %204, %205, %cst_86 {dimension_numbers = #tpu.dot_dimension_numbers<[2], [2], [1], [1], [0, 0, 0, 1, 1, 1], [0], [0]>} : vector<2x8x8xbf16>, vector<2x8x8xbf16>, vector<2x8x8xf32> -> vector<2x8x8xf32>
    "tpu.trace_stop"() : () -> ()
    %cst_87 = arith.constant 0.353553385 : f32
    %208 = vector.broadcast %cst_87 : f32 to vector<2x8x8xf32>
    %209 = arith.mulf %207, %208 : vector<2x8x8xf32>
    %cst_88 = arith.constant dense<0xFF800000> : vector<2x8xf32>
    %210 = vector.multi_reduction <maximumf>, %209, %cst_88 [2] : vector<2x8x8xf32> to vector<2x8xf32>
    %211 = vector.shape_cast %210 : vector<2x8xf32> to vector<2x8x1xf32>
    %212 = vector.broadcast %211 : vector<2x8x1xf32> to vector<2x8x8xf32>
    %213 = arith.subf %209, %212 : vector<2x8x8xf32>
    %214 = math.exp %213 : vector<2x8x8xf32>
    %cst_89 = arith.constant dense<0.000000e+00> : vector<2x8xf32>
    %215 = vector.multi_reduction <add>, %214, %cst_89 [2] : vector<2x8x8xf32> to vector<2x8xf32>
    %216 = vector.shape_cast %215 : vector<2x8xf32> to vector<2x8x1xf32>
    %217 = tpu.reciprocal %216 {approx = true} : vector<2x8x1xf32> -> vector<2x8x1xf32>
    %218 = vector.broadcast %217 : vector<2x8x1xf32> to vector<2x8x8xf32>
    %219 = arith.mulf %214, %218 : vector<2x8x8xf32>
    %220 = arith.truncf %219 : vector<2x8x8xf32> to vector<2x8x8xbf16>
    "tpu.trace_start"() <{level = 10 : i32, message = "bqk,bkd->bqd"}> : () -> ()
    %cst_90 = arith.constant dense<0.000000e+00> : vector<2x8x8xf32>
    %221 = tpu.matmul %220, %206, %cst_90 {dimension_numbers = #tpu.dot_dimension_numbers<[2], [1], [1], [2], [0, 0, 0, 1, 1, 2], [0], [0]>} : vector<2x8x8xbf16>, vector<2x8x8xbf16>, vector<2x8x8xf32> -> vector<2x8x8xf32>
    "tpu.trace_stop"() : () -> ()
    %222 = vector.extract_strided_slice %199 {offsets = [0, 0, 8], sizes = [2, 8, 8], strides = [1, 1, 1]} : vector<2x8x32xbf16> to vector<2x8x8xbf16>
    %223 = vector.extract_strided_slice %201 {offsets = [0, 0, 8], sizes = [2, 8, 8], strides = [1, 1, 1]} : vector<2x8x32xbf16> to vector<2x8x8xbf16>
    %224 = vector.extract_strided_slice %203 {offsets = [0, 0, 8], sizes = [2, 8, 8], strides = [1, 1, 1]} : vector<2x8x32xbf16> to vector<2x8x8xbf16>
    "tpu.trace_start"() <{level = 10 : i32, message = "bqd,bkd->bqk"}> : () -> ()
    %cst_91 = arith.constant dense<0.000000e+00> : vector<2x8x8xf32>
    %225 = tpu.matmul %222, %223, %cst_91 {dimension_numbers = #tpu.dot_dimension_numbers<[2], [2], [1], [1], [0, 0, 0, 1, 1, 1], [0], [0]>} : vector<2x8x8xbf16>, vector<2x8x8xbf16>, vector<2x8x8xf32> -> vector<2x8x8xf32>
    "tpu.trace_stop"() : () -> ()
    %cst_92 = arith.constant 0.353553385 : f32
    %226 = vector.broadcast %cst_92 : f32 to vector<2x8x8xf32>
    %227 = arith.mulf %225, %226 : vector<2x8x8xf32>
    %cst_93 = arith.constant dense<0xFF800000> : vector<2x8xf32>
    %228 = vector.multi_reduction <maximumf>, %227, %cst_93 [2] : vector<2x8x8xf32> to vector<2x8xf32>
    %229 = vector.shape_cast %228 : vector<2x8xf32> to vector<2x8x1xf32>
    %230 = vector.broadcast %229 : vector<2x8x1xf32> to vector<2x8x8xf32>
    %231 = arith.subf %227, %230 : vector<2x8x8xf32>
    %232 = math.exp %231 : vector<2x8x8xf32>
    %cst_94 = arith.constant dense<0.000000e+00> : vector<2x8xf32>
    %233 = vector.multi_reduction <add>, %232, %cst_94 [2] : vector<2x8x8xf32> to vector<2x8xf32>
    %234 = vector.shape_cast %233 : vector<2x8xf32> to vector<2x8x1xf32>
    %235 = tpu.reciprocal %234 {approx = true} : vector<2x8x1xf32> -> vector<2x8x1xf32>
    %236 = vector.broadcast %235 : vector<2x8x1xf32> to vector<2x8x8xf32>
    %237 = arith.mulf %232, %236 : vector<2x8x8xf32>
    %238 = arith.truncf %237 : vector<2x8x8xf32> to vector<2x8x8xbf16>
    "tpu.trace_start"() <{level = 10 : i32, message = "bqk,bkd->bqd"}> : () -> ()
    %cst_95 = arith.constant dense<0.000000e+00> : vector<2x8x8xf32>
    %239 = tpu.matmul %238, %224, %cst_95 {dimension_numbers = #tpu.dot_dimension_numbers<[2], [1], [1], [2], [0, 0, 0, 1, 1, 2], [0], [0]>} : vector<2x8x8xbf16>, vector<2x8x8xbf16>, vector<2x8x8xf32> -> vector<2x8x8xf32>
    "tpu.trace_stop"() : () -> ()
    %240 = vector.extract_strided_slice %199 {offsets = [0, 0, 16], sizes = [2, 8, 8], strides = [1, 1, 1]} : vector<2x8x32xbf16> to vector<2x8x8xbf16>
    %241 = vector.extract_strided_slice %201 {offsets = [0, 0, 16], sizes = [2, 8, 8], strides = [1, 1, 1]} : vector<2x8x32xbf16> to vector<2x8x8xbf16>
    %242 = vector.extract_strided_slice %203 {offsets = [0, 0, 16], sizes = [2, 8, 8], strides = [1, 1, 1]} : vector<2x8x32xbf16> to vector<2x8x8xbf16>
    "tpu.trace_start"() <{level = 10 : i32, message = "bqd,bkd->bqk"}> : () -> ()
    %cst_96 = arith.constant dense<0.000000e+00> : vector<2x8x8xf32>
    %243 = tpu.matmul %240, %241, %cst_96 {dimension_numbers = #tpu.dot_dimension_numbers<[2], [2], [1], [1], [0, 0, 0, 1, 1, 1], [0], [0]>} : vector<2x8x8xbf16>, vector<2x8x8xbf16>, vector<2x8x8xf32> -> vector<2x8x8xf32>
    "tpu.trace_stop"() : () -> ()
    %cst_97 = arith.constant 0.353553385 : f32
    %244 = vector.broadcast %cst_97 : f32 to vector<2x8x8xf32>
    %245 = arith.mulf %243, %244 : vector<2x8x8xf32>
    %cst_98 = arith.constant dense<0xFF800000> : vector<2x8xf32>
    %246 = vector.multi_reduction <maximumf>, %245, %cst_98 [2] : vector<2x8x8xf32> to vector<2x8xf32>
    %247 = vector.shape_cast %246 : vector<2x8xf32> to vector<2x8x1xf32>
    %248 = vector.broadcast %247 : vector<2x8x1xf32> to vector<2x8x8xf32>
    %249 = arith.subf %245, %248 : vector<2x8x8xf32>
    %250 = math.exp %249 : vector<2x8x8xf32>
    %cst_99 = arith.constant dense<0.000000e+00> : vector<2x8xf32>
    %251 = vector.multi_reduction <add>, %250, %cst_99 [2] : vector<2x8x8xf32> to vector<2x8xf32>
    %252 = vector.shape_cast %251 : vector<2x8xf32> to vector<2x8x1xf32>
    %253 = tpu.reciprocal %252 {approx = true} : vector<2x8x1xf32> -> vector<2x8x1xf32>
    %254 = vector.broadcast %253 : vector<2x8x1xf32> to vector<2x8x8xf32>
    %255 = arith.mulf %250, %254 : vector<2x8x8xf32>
    %256 = arith.truncf %255 : vector<2x8x8xf32> to vector<2x8x8xbf16>
    "tpu.trace_start"() <{level = 10 : i32, message = "bqk,bkd->bqd"}> : () -> ()
    %cst_100 = arith.constant dense<0.000000e+00> : vector<2x8x8xf32>
    %257 = tpu.matmul %256, %242, %cst_100 {dimension_numbers = #tpu.dot_dimension_numbers<[2], [1], [1], [2], [0, 0, 0, 1, 1, 2], [0], [0]>} : vector<2x8x8xbf16>, vector<2x8x8xbf16>, vector<2x8x8xf32> -> vector<2x8x8xf32>
    "tpu.trace_stop"() : () -> ()
    %258 = vector.extract_strided_slice %199 {offsets = [0, 0, 24], sizes = [2, 8, 8], strides = [1, 1, 1]} : vector<2x8x32xbf16> to vector<2x8x8xbf16>
    %259 = vector.extract_strided_slice %201 {offsets = [0, 0, 24], sizes = [2, 8, 8], strides = [1, 1, 1]} : vector<2x8x32xbf16> to vector<2x8x8xbf16>
    %260 = vector.extract_strided_slice %203 {offsets = [0, 0, 24], sizes = [2, 8, 8], strides = [1, 1, 1]} : vector<2x8x32xbf16> to vector<2x8x8xbf16>
    "tpu.trace_start"() <{level = 10 : i32, message = "bqd,bkd->bqk"}> : () -> ()
    %cst_101 = arith.constant dense<0.000000e+00> : vector<2x8x8xf32>
    %261 = tpu.matmul %258, %259, %cst_101 {dimension_numbers = #tpu.dot_dimension_numbers<[2], [2], [1], [1], [0, 0, 0, 1, 1, 1], [0], [0]>} : vector<2x8x8xbf16>, vector<2x8x8xbf16>, vector<2x8x8xf32> -> vector<2x8x8xf32>
    "tpu.trace_stop"() : () -> ()
    %cst_102 = arith.constant 0.353553385 : f32
    %262 = vector.broadcast %cst_102 : f32 to vector<2x8x8xf32>
    %263 = arith.mulf %261, %262 : vector<2x8x8xf32>
    %cst_103 = arith.constant dense<0xFF800000> : vector<2x8xf32>
    %264 = vector.multi_reduction <maximumf>, %263, %cst_103 [2] : vector<2x8x8xf32> to vector<2x8xf32>
    %265 = vector.shape_cast %264 : vector<2x8xf32> to vector<2x8x1xf32>
    %266 = vector.broadcast %265 : vector<2x8x1xf32> to vector<2x8x8xf32>
    %267 = arith.subf %263, %266 : vector<2x8x8xf32>
    %268 = math.exp %267 : vector<2x8x8xf32>
    %cst_104 = arith.constant dense<0.000000e+00> : vector<2x8xf32>
    %269 = vector.multi_reduction <add>, %268, %cst_104 [2] : vector<2x8x8xf32> to vector<2x8xf32>
    %270 = vector.shape_cast %269 : vector<2x8xf32> to vector<2x8x1xf32>
    %271 = tpu.reciprocal %270 {approx = true} : vector<2x8x1xf32> -> vector<2x8x1xf32>
    %272 = vector.broadcast %271 : vector<2x8x1xf32> to vector<2x8x8xf32>
    %273 = arith.mulf %268, %272 : vector<2x8x8xf32>
    %274 = arith.truncf %273 : vector<2x8x8xf32> to vector<2x8x8xbf16>
    "tpu.trace_start"() <{level = 10 : i32, message = "bqk,bkd->bqd"}> : () -> ()
    %cst_105 = arith.constant dense<0.000000e+00> : vector<2x8x8xf32>
    %275 = tpu.matmul %274, %260, %cst_105 {dimension_numbers = #tpu.dot_dimension_numbers<[2], [1], [1], [2], [0, 0, 0, 1, 1, 2], [0], [0]>} : vector<2x8x8xbf16>, vector<2x8x8xbf16>, vector<2x8x8xf32> -> vector<2x8x8xf32>
    "tpu.trace_stop"() : () -> ()
    %276 = tpu.concatenate %221, %239, %257, %275 in 2 : vector<2x8x8xf32>, vector<2x8x8xf32>, vector<2x8x8xf32>, vector<2x8x8xf32> -> vector<2x8x32xf32>
    %277 = vector.shape_cast %276 : vector<2x8x32xf32> to vector<16x32xf32>
    %c0_106 = arith.constant 0 : index
    %c0_107 = arith.constant 0 : index
    %c0_108 = arith.constant 0 : index
    %278 = vector.load %arg17[%c0_106, %c0_107, %c0_108] : memref<1x32x32xbf16, #tpu.memory_space<vmem>>, vector<1x32x32xbf16>
    %279 = vector.shape_cast %278 : vector<1x32x32xbf16> to vector<32x32xbf16>
    %280 = arith.truncf %277 : vector<16x32xf32> to vector<16x32xbf16>
    %cst_109 = arith.constant dense<0.000000e+00> : vector<16x32xf32>
    %281 = tpu.matmul %280, %279, %cst_109 {dimension_numbers = #tpu.dot_dimension_numbers<[1], [0], [0], [1], [0, 0, 1, 1], [], []>} : vector<16x32xbf16>, vector<32x32xbf16>, vector<16x32xf32> -> vector<16x32xf32>
    %c0_110 = arith.constant 0 : index
    %c0_111 = arith.constant 0 : index
    %c0_112 = arith.constant 0 : index
    %282 = vector.load %arg18[%c0_110, %c0_111, %c0_112] : memref<1x1x32xf32, #tpu.memory_space<vmem>>, vector<1x1x32xf32>
    %283 = vector.shape_cast %282 : vector<1x1x32xf32> to vector<1x32xf32>
    %284 = vector.broadcast %283 : vector<1x32xf32> to vector<16x32xf32>
    %285 = arith.addf %281, %284 : vector<16x32xf32>
    %286 = arith.addf %179, %285 : vector<16x32xf32>
    %cst_113 = arith.constant dense<0.000000e+00> : vector<16xf32>
    %287 = vector.multi_reduction <add>, %286, %cst_113 [1] : vector<16x32xf32> to vector<16xf32>
    %288 = vector.shape_cast %287 : vector<16xf32> to vector<16x1xf32>
    %cst_114 = arith.constant 3.200000e+01 : f32
    %289 = vector.broadcast %cst_114 : f32 to vector<16x1xf32>
    %290 = arith.divf %288, %289 : vector<16x1xf32>
    %291 = vector.broadcast %290 : vector<16x1xf32> to vector<16x32xf32>
    %292 = arith.subf %286, %291 : vector<16x32xf32>
    %293 = arith.mulf %292, %292 : vector<16x32xf32>
    %cst_115 = arith.constant dense<0.000000e+00> : vector<16xf32>
    %294 = vector.multi_reduction <add>, %293, %cst_115 [1] : vector<16x32xf32> to vector<16xf32>
    %295 = vector.shape_cast %294 : vector<16xf32> to vector<16x1xf32>
    %cst_116 = arith.constant 3.200000e+01 : f32
    %296 = vector.broadcast %cst_116 : f32 to vector<16x1xf32>
    %297 = arith.divf %295, %296 : vector<16x1xf32>
    %298 = vector.broadcast %290 : vector<16x1xf32> to vector<16x32xf32>
    %299 = arith.subf %286, %298 : vector<16x32xf32>
    %cst_117 = arith.constant 9.99999974E-6 : f32
    %300 = vector.broadcast %cst_117 : f32 to vector<16x1xf32>
    %301 = arith.addf %297, %300 : vector<16x1xf32>
    %302 = math.rsqrt %301 : vector<16x1xf32>
    %303 = vector.broadcast %302 : vector<16x1xf32> to vector<16x32xf32>
    %304 = arith.mulf %299, %303 : vector<16x32xf32>
    %c0_118 = arith.constant 0 : index
    %c0_119 = arith.constant 0 : index
    %c0_120 = arith.constant 0 : index
    %305 = vector.load %arg19[%c0_118, %c0_119, %c0_120] : memref<1x1x32xf32, #tpu.memory_space<vmem>>, vector<1x1x32xf32>
    %306 = vector.shape_cast %305 : vector<1x1x32xf32> to vector<1x32xf32>
    %307 = vector.broadcast %306 : vector<1x32xf32> to vector<16x32xf32>
    %308 = arith.mulf %304, %307 : vector<16x32xf32>
    %c0_121 = arith.constant 0 : index
    %c0_122 = arith.constant 0 : index
    %c0_123 = arith.constant 0 : index
    %309 = vector.load %arg20[%c0_121, %c0_122, %c0_123] : memref<1x1x32xf32, #tpu.memory_space<vmem>>, vector<1x1x32xf32>
    %310 = vector.shape_cast %309 : vector<1x1x32xf32> to vector<1x32xf32>
    %311 = vector.broadcast %310 : vector<1x32xf32> to vector<16x32xf32>
    %312 = arith.addf %308, %311 : vector<16x32xf32>
    %c0_124 = arith.constant 0 : index
    %c0_125 = arith.constant 0 : index
    %c0_126 = arith.constant 0 : index
    %313 = vector.load %arg21[%c0_124, %c0_125, %c0_126] : memref<1x32x64xbf16, #tpu.memory_space<vmem>>, vector<1x32x64xbf16>
    %314 = vector.shape_cast %313 : vector<1x32x64xbf16> to vector<32x64xbf16>
    %315 = arith.truncf %312 : vector<16x32xf32> to vector<16x32xbf16>
    %cst_127 = arith.constant dense<0.000000e+00> : vector<16x64xf32>
    %316 = tpu.matmul %315, %314, %cst_127 {dimension_numbers = #tpu.dot_dimension_numbers<[1], [0], [0], [1], [0, 0, 1, 1], [], []>} : vector<16x32xbf16>, vector<32x64xbf16>, vector<16x64xf32> -> vector<16x64xf32>
    %c0_128 = arith.constant 0 : index
    %c0_129 = arith.constant 0 : index
    %c0_130 = arith.constant 0 : index
    %317 = vector.load %arg22[%c0_128, %c0_129, %c0_130] : memref<1x1x64xf32, #tpu.memory_space<vmem>>, vector<1x1x64xf32>
    %318 = vector.shape_cast %317 : vector<1x1x64xf32> to vector<1x64xf32>
    %319 = vector.broadcast %318 : vector<1x64xf32> to vector<16x64xf32>
    %320 = arith.addf %316, %319 : vector<16x64xf32>
    %cst_131 = arith.constant 0.000000e+00 : f32
    %321 = vector.broadcast %cst_131 : f32 to vector<16x64xf32>
    %322 = arith.cmpf oge, %320, %321 : vector<16x64xf32>
    %cst_132 = arith.constant 0.00999999977 : f32
    %323 = vector.broadcast %cst_132 : f32 to vector<16x64xf32>
    %324 = arith.mulf %323, %320 : vector<16x64xf32>
    %325 = arith.select %322, %320, %324 : vector<16x64xi1>, vector<16x64xf32>
    %c0_133 = arith.constant 0 : index
    %c0_134 = arith.constant 0 : index
    %c0_135 = arith.constant 0 : index
    %326 = vector.load %arg23[%c0_133, %c0_134, %c0_135] : memref<1x64x32xbf16, #tpu.memory_space<vmem>>, vector<1x64x32xbf16>
    %327 = vector.shape_cast %326 : vector<1x64x32xbf16> to vector<64x32xbf16>
    %328 = arith.truncf %325 : vector<16x64xf32> to vector<16x64xbf16>
    %cst_136 = arith.constant dense<0.000000e+00> : vector<16x32xf32>
    %329 = tpu.matmul %328, %327, %cst_136 {dimension_numbers = #tpu.dot_dimension_numbers<[1], [0], [0], [1], [0, 0, 1, 1], [], []>} : vector<16x64xbf16>, vector<64x32xbf16>, vector<16x32xf32> -> vector<16x32xf32>
    %c0_137 = arith.constant 0 : index
    %c0_138 = arith.constant 0 : index
    %c0_139 = arith.constant 0 : index
    %330 = vector.load %arg24[%c0_137, %c0_138, %c0_139] : memref<1x1x32xf32, #tpu.memory_space<vmem>>, vector<1x1x32xf32>
    %331 = vector.shape_cast %330 : vector<1x1x32xf32> to vector<1x32xf32>
    %332 = vector.broadcast %331 : vector<1x32xf32> to vector<16x32xf32>
    %333 = arith.addf %329, %332 : vector<16x32xf32>
    %334 = arith.addf %312, %333 : vector<16x32xf32>
    %cst_140 = arith.constant dense<0.000000e+00> : vector<16xf32>
    %335 = vector.multi_reduction <add>, %334, %cst_140 [1] : vector<16x32xf32> to vector<16xf32>
    %336 = vector.shape_cast %335 : vector<16xf32> to vector<16x1xf32>
    %cst_141 = arith.constant 3.200000e+01 : f32
    %337 = vector.broadcast %cst_141 : f32 to vector<16x1xf32>
    %338 = arith.divf %336, %337 : vector<16x1xf32>
    %339 = vector.broadcast %338 : vector<16x1xf32> to vector<16x32xf32>
    %340 = arith.subf %334, %339 : vector<16x32xf32>
    %341 = arith.mulf %340, %340 : vector<16x32xf32>
    %cst_142 = arith.constant dense<0.000000e+00> : vector<16xf32>
    %342 = vector.multi_reduction <add>, %341, %cst_142 [1] : vector<16x32xf32> to vector<16xf32>
    %343 = vector.shape_cast %342 : vector<16xf32> to vector<16x1xf32>
    %cst_143 = arith.constant 3.200000e+01 : f32
    %344 = vector.broadcast %cst_143 : f32 to vector<16x1xf32>
    %345 = arith.divf %343, %344 : vector<16x1xf32>
    %346 = vector.broadcast %338 : vector<16x1xf32> to vector<16x32xf32>
    %347 = arith.subf %334, %346 : vector<16x32xf32>
    %cst_144 = arith.constant 9.99999974E-6 : f32
    %348 = vector.broadcast %cst_144 : f32 to vector<16x1xf32>
    %349 = arith.addf %345, %348 : vector<16x1xf32>
    %350 = math.rsqrt %349 : vector<16x1xf32>
    %351 = vector.broadcast %350 : vector<16x1xf32> to vector<16x32xf32>
    %352 = arith.mulf %347, %351 : vector<16x32xf32>
    %c0_145 = arith.constant 0 : index
    %c0_146 = arith.constant 0 : index
    %c0_147 = arith.constant 0 : index
    %353 = vector.load %arg25[%c0_145, %c0_146, %c0_147] : memref<1x1x32xf32, #tpu.memory_space<vmem>>, vector<1x1x32xf32>
    %354 = vector.shape_cast %353 : vector<1x1x32xf32> to vector<1x32xf32>
    %355 = vector.broadcast %354 : vector<1x32xf32> to vector<16x32xf32>
    %356 = arith.mulf %352, %355 : vector<16x32xf32>
    %c0_148 = arith.constant 0 : index
    %c0_149 = arith.constant 0 : index
    %c0_150 = arith.constant 0 : index
    %357 = vector.load %arg26[%c0_148, %c0_149, %c0_150] : memref<1x1x32xf32, #tpu.memory_space<vmem>>, vector<1x1x32xf32>
    %358 = vector.shape_cast %357 : vector<1x1x32xf32> to vector<1x32xf32>
    %359 = vector.broadcast %358 : vector<1x32xf32> to vector<16x32xf32>
    %360 = arith.addf %356, %359 : vector<16x32xf32>
    %c0_151 = arith.constant 0 : index
    %c0_152 = arith.constant 0 : index
    %c0_153 = arith.constant 0 : index
    %361 = vector.load %arg27[%c0_151, %c0_152, %c0_153] : memref<1x32x32xbf16, #tpu.memory_space<vmem>>, vector<1x32x32xbf16>
    %362 = vector.shape_cast %361 : vector<1x32x32xbf16> to vector<32x32xbf16>
    %363 = arith.truncf %360 : vector<16x32xf32> to vector<16x32xbf16>
    %cst_154 = arith.constant dense<0.000000e+00> : vector<16x32xf32>
    %364 = tpu.matmul %363, %362, %cst_154 {dimension_numbers = #tpu.dot_dimension_numbers<[1], [0], [0], [1], [0, 0, 1, 1], [], []>} : vector<16x32xbf16>, vector<32x32xbf16>, vector<16x32xf32> -> vector<16x32xf32>
    %c0_155 = arith.constant 0 : index
    %c0_156 = arith.constant 0 : index
    %c0_157 = arith.constant 0 : index
    %365 = vector.load %arg28[%c0_155, %c0_156, %c0_157] : memref<1x1x32xf32, #tpu.memory_space<vmem>>, vector<1x1x32xf32>
    %366 = vector.shape_cast %365 : vector<1x1x32xf32> to vector<1x32xf32>
    %367 = vector.broadcast %366 : vector<1x32xf32> to vector<16x32xf32>
    %368 = arith.addf %364, %367 : vector<16x32xf32>
    %c0_158 = arith.constant 0 : index
    %c0_159 = arith.constant 0 : index
    %c0_160 = arith.constant 0 : index
    %369 = vector.load %arg29[%c0_158, %c0_159, %c0_160] : memref<1x64x32xbf16, #tpu.memory_space<vmem>>, vector<1x64x32xbf16>
    %370 = vector.shape_cast %369 : vector<1x64x32xbf16> to vector<64x32xbf16>
    %371 = vector.extract_strided_slice %370 {offsets = [0, 0], sizes = [32, 32], strides = [1, 1]} : vector<64x32xbf16> to vector<32x32xbf16>
    %372 = arith.truncf %368 : vector<16x32xf32> to vector<16x32xbf16>
    %cst_161 = arith.constant dense<0.000000e+00> : vector<16x32xf32>
    %373 = tpu.matmul %372, %371, %cst_161 {dimension_numbers = #tpu.dot_dimension_numbers<[1], [0], [0], [1], [0, 0, 1, 1], [], []>} : vector<16x32xbf16>, vector<32x32xbf16>, vector<16x32xf32> -> vector<16x32xf32>
    %374 = vector.extract_strided_slice %370 {offsets = [32, 0], sizes = [32, 32], strides = [1, 1]} : vector<64x32xbf16> to vector<32x32xbf16>
    %375 = arith.truncf %2 : vector<16x32xf32> to vector<16x32xbf16>
    %cst_162 = arith.constant dense<0.000000e+00> : vector<16x32xf32>
    %376 = tpu.matmul %375, %374, %cst_162 {dimension_numbers = #tpu.dot_dimension_numbers<[1], [0], [0], [1], [0, 0, 1, 1], [], []>} : vector<16x32xbf16>, vector<32x32xbf16>, vector<16x32xf32> -> vector<16x32xf32>
    %377 = arith.addf %373, %376 : vector<16x32xf32>
    %c0_163 = arith.constant 0 : index
    %c0_164 = arith.constant 0 : index
    %c0_165 = arith.constant 0 : index
    %378 = vector.load %arg30[%c0_163, %c0_164, %c0_165] : memref<1x1x32xf32, #tpu.memory_space<vmem>>, vector<1x1x32xf32>
    %379 = vector.shape_cast %378 : vector<1x1x32xf32> to vector<1x32xf32>
    %380 = vector.broadcast %379 : vector<1x32xf32> to vector<16x32xf32>
    %381 = arith.addf %377, %380 : vector<16x32xf32>
    %382 = vector.shape_cast %381 : vector<16x32xf32> to vector<2x8x32xf32>
    %c0_166 = arith.constant 0 : index
    %c0_167 = arith.constant 0 : index
    %c0_168 = arith.constant 0 : index
    %c0_169 = arith.constant 0 : index
    %383 = vector.load %arg31[%c0_166, %c0_167, %c0_168, %c0_169] : memref<1x2x8x32xf32, #tpu.memory_space<vmem>>, vector<1x2x8x32xf32>
    %384 = vector.shape_cast %383 : vector<1x2x8x32xf32> to vector<2x8x32xf32>
    %385 = vector.shape_cast %382 : vector<2x8x32xf32> to vector<1x2x8x32xf32>
    tpu.vector_store %arg31[%c0_166, %c0_167, %c0_168, %c0_169], %385 {strides = array<i32>} : memref<1x2x8x32xf32, #tpu.memory_space<vmem>>, vector<1x2x8x32xf32>,
    return
  }
  func.func @transform_0(%arg0: i32) -> (i32, i32, i32, i32) {
    %c0_i32 = arith.constant 0 : i32
    %c0_i32_0 = arith.constant 0 : i32
    %c0_i32_1 = arith.constant 0 : i32
    %c0_i32_2 = arith.constant 0 : i32
    return %arg0, %c0_i32, %c0_i32_0, %c0_i32_1 : i32, i32, i32, i32
  }
  func.func @transform_1(%arg0: i32) -> (i32, i32, i32, i32) {
    %c0_i32 = arith.constant 0 : i32
    %c0_i32_0 = arith.constant 0 : i32
    %c0_i32_1 = arith.constant 0 : i32
    %c0_i32_2 = arith.constant 0 : i32
    return %arg0, %c0_i32, %c0_i32_0, %c0_i32_1 : i32, i32, i32, i32
  }
  func.func @transform_2(%arg0: i32) -> (i32, i32, i32) {
    %c0_i32 = arith.constant 0 : i32
    %c0_i32_0 = arith.constant 0 : i32
    %c0_i32_1 = arith.constant 0 : i32
    return %arg0, %c0_i32, %c0_i32_0 : i32, i32, i32
  }
  func.func @transform_3(%arg0: i32) -> (i32, i32, i32) {
    %c0_i32 = arith.constant 0 : i32
    %c0_i32_0 = arith.constant 0 : i32
    %c0_i32_1 = arith.constant 0 : i32
    return %arg0, %c0_i32, %c0_i32_0 : i32, i32, i32
  }
  func.func @transform_4(%arg0: i32) -> (i32, i32, i32) {
    %c0_i32 = arith.constant 0 : i32
    %c0_i32_0 = arith.constant 0 : i32
    %c0_i32_1 = arith.constant 0 : i32
    return %arg0, %c0_i32, %c0_i32_0 : i32, i32, i32
  }
  func.func @transform_5(%arg0: i32) -> (i32, i32, i32) {
    %c0_i32 = arith.constant 0 : i32
    %c0_i32_0 = arith.constant 0 : i32
    %c0_i32_1 = arith.constant 0 : i32
    return %arg0, %c0_i32, %c0_i32_0 : i32, i32, i32
  }
  func.func @transform_6(%arg0: i32) -> (i32, i32, i32) {
    %c0_i32 = arith.constant 0 : i32
    %c0_i32_0 = arith.constant 0 : i32
    %c0_i32_1 = arith.constant 0 : i32
    return %arg0, %c0_i32, %c0_i32_0 : i32, i32, i32
  }
  func.func @transform_7(%arg0: i32) -> (i32, i32, i32) {
    %c0_i32 = arith.constant 0 : i32
    %c0_i32_0 = arith.constant 0 : i32
    %c0_i32_1 = arith.constant 0 : i32
    return %arg0, %c0_i32, %c0_i32_0 : i32, i32, i32
  }
  func.func @transform_8(%arg0: i32) -> (i32, i32, i32) {
    %c0_i32 = arith.constant 0 : i32
    %c0_i32_0 = arith.constant 0 : i32
    %c0_i32_1 = arith.constant 0 : i32
    return %arg0, %c0_i32, %c0_i32_0 : i32, i32, i32
  }
  func.func @transform_9(%arg0: i32) -> (i32, i32, i32) {
    %c0_i32 = arith.constant 0 : i32
    %c0_i32_0 = arith.constant 0 : i32
    %c0_i32_1 = arith.constant 0 : i32
    return %arg0, %c0_i32, %c0_i32_0 : i32, i32, i32
  }
  func.func @transform_10(%arg0: i32) -> (i32, i32, i32) {
    %c0_i32 = arith.constant 0 : i32
    %c0_i32_0 = arith.constant 0 : i32
    %c0_i32_1 = arith.constant 0 : i32
    return %arg0, %c0_i32, %c0_i32_0 : i32, i32, i32
  }
  func.func @transform_11(%arg0: i32) -> (i32, i32, i32) {
    %c0_i32 = arith.constant 0 : i32
    %c0_i32_0 = arith.constant 0 : i32
    %c0_i32_1 = arith.constant 0 : i32
    return %arg0, %c0_i32, %c0_i32_0 : i32, i32, i32
  }
  func.func @transform_12(%arg0: i32) -> (i32, i32, i32) {
    %c0_i32 = arith.constant 0 : i32
    %c0_i32_0 = arith.constant 0 : i32
    %c0_i32_1 = arith.constant 0 : i32
    return %arg0, %c0_i32, %c0_i32_0 : i32, i32, i32
  }
  func.func @transform_13(%arg0: i32) -> (i32, i32, i32) {
    %c0_i32 = arith.constant 0 : i32
    %c0_i32_0 = arith.constant 0 : i32
    %c0_i32_1 = arith.constant 0 : i32
    return %arg0, %c0_i32, %c0_i32_0 : i32, i32, i32
  }
  func.func @transform_14(%arg0: i32) -> (i32, i32, i32) {
    %c0_i32 = arith.constant 0 : i32
    %c0_i32_0 = arith.constant 0 : i32
    %c0_i32_1 = arith.constant 0 : i32
    return %arg0, %c0_i32, %c0_i32_0 : i32, i32, i32
  }
  func.func @transform_15(%arg0: i32) -> (i32, i32, i32) {
    %c0_i32 = arith.constant 0 : i32
    %c0_i32_0 = arith.constant 0 : i32
    %c0_i32_1 = arith.constant 0 : i32
    return %arg0, %c0_i32, %c0_i32_0 : i32, i32, i32
  }
  func.func @transform_16(%arg0: i32) -> (i32, i32, i32) {
    %c0_i32 = arith.constant 0 : i32
    %c0_i32_0 = arith.constant 0 : i32
    %c0_i32_1 = arith.constant 0 : i32
    return %arg0, %c0_i32, %c0_i32_0 : i32, i32, i32
  }
  func.func @transform_17(%arg0: i32) -> (i32, i32, i32) {
    %c0_i32 = arith.constant 0 : i32
    %c0_i32_0 = arith.constant 0 : i32
    %c0_i32_1 = arith.constant 0 : i32
    return %arg0, %c0_i32, %c0_i32_0 : i32, i32, i32
  }
  func.func @transform_18(%arg0: i32) -> (i32, i32, i32) {
    %c0_i32 = arith.constant 0 : i32
    %c0_i32_0 = arith.constant 0 : i32
    %c0_i32_1 = arith.constant 0 : i32
    return %arg0, %c0_i32, %c0_i32_0 : i32, i32, i32
  }
  func.func @transform_19(%arg0: i32) -> (i32, i32, i32) {
    %c0_i32 = arith.constant 0 : i32
    %c0_i32_0 = arith.constant 0 : i32
    %c0_i32_1 = arith.constant 0 : i32
    return %arg0, %c0_i32, %c0_i32_0 : i32, i32, i32
  }
  func.func @transform_20(%arg0: i32) -> (i32, i32, i32) {
    %c0_i32 = arith.constant 0 : i32
    %c0_i32_0 = arith.constant 0 : i32
    %c0_i32_1 = arith.constant 0 : i32
    return %arg0, %c0_i32, %c0_i32_0 : i32, i32, i32
  }
  func.func @transform_21(%arg0: i32) -> (i32, i32, i32) {
    %c0_i32 = arith.constant 0 : i32
    %c0_i32_0 = arith.constant 0 : i32
    %c0_i32_1 = arith.constant 0 : i32
    return %arg0, %c0_i32, %c0_i32_0 : i32, i32, i32
  }
  func.func @transform_22(%arg0: i32) -> (i32, i32, i32) {
    %c0_i32 = arith.constant 0 : i32
    %c0_i32_0 = arith.constant 0 : i32
    %c0_i32_1 = arith.constant 0 : i32
    return %arg0, %c0_i32, %c0_i32_0 : i32, i32, i32
  }
  func.func @transform_23(%arg0: i32) -> (i32, i32, i32) {
    %c0_i32 = arith.constant 0 : i32
    %c0_i32_0 = arith.constant 0 : i32
    %c0_i32_1 = arith.constant 0 : i32
    return %arg0, %c0_i32, %c0_i32_0 : i32, i32, i32
  }
  func.func @transform_24(%arg0: i32) -> (i32, i32, i32) {
    %c0_i32 = arith.constant 0 : i32
    %c0_i32_0 = arith.constant 0 : i32
    %c0_i32_1 = arith.constant 0 : i32
    return %arg0, %c0_i32, %c0_i32_0 : i32, i32, i32
  }
  func.func @transform_25(%arg0: i32) -> (i32, i32, i32) {
    %c0_i32 = arith.constant 0 : i32
    %c0_i32_0 = arith.constant 0 : i32
    %c0_i32_1 = arith.constant 0 : i32
    return %arg0, %c0_i32, %c0_i32_0 : i32, i32, i32
  }
  func.func @transform_26(%arg0: i32) -> (i32, i32, i32) {
    %c0_i32 = arith.constant 0 : i32
    %c0_i32_0 = arith.constant 0 : i32
    %c0_i32_1 = arith.constant 0 : i32
    return %arg0, %c0_i32, %c0_i32_0 : i32, i32, i32
  }
  func.func @transform_27(%arg0: i32) -> (i32, i32, i32) {
    %c0_i32 = arith.constant 0 : i32
    %c0_i32_0 = arith.constant 0 : i32
    %c0_i32_1 = arith.constant 0 : i32
    return %arg0, %c0_i32, %c0_i32_0 : i32, i32, i32
  }
  func.func @transform_28(%arg0: i32) -> (i32, i32, i32) {
    %c0_i32 = arith.constant 0 : i32
    %c0_i32_0 = arith.constant 0 : i32
    %c0_i32_1 = arith.constant 0 : i32
    return %arg0, %c0_i32, %c0_i32_0 : i32, i32, i32
  }
  func.func @transform_29(%arg0: i32) -> (i32, i32, i32) {
    %c0_i32 = arith.constant 0 : i32
    %c0_i32_0 = arith.constant 0 : i32
    %c0_i32_1 = arith.constant 0 : i32
    return %arg0, %c0_i32, %c0_i32_0 : i32, i32, i32
  }
  func.func @transform_30(%arg0: i32) -> (i32, i32, i32, i32) {
    %c0_i32 = arith.constant 0 : i32
    %c0_i32_0 = arith.constant 0 : i32
    %c0_i32_1 = arith.constant 0 : i32
    %c0_i32_2 = arith.constant 0 : i32
    return %arg0, %c0_i32, %c0_i32_0, %c0_i32_1 : i32, i32, i32, i32
  }
}

</mosaic_0001>

<bundles_post_ra>
// kernel: style_attention_forward.1
= control target key start
LH: loop header
LB: loop body
LE: loop exit
PB: predicated region body
PF: predicated region fallthrough
CT: control target
= control target key end

     0   :  { %s3912_s6 = smov 1   ;;  %s3913_s10 = smov 2   ;;  %s4541_s0 = inlined_call_operand.smem [shape: u32[31], index: -1, kind: input, shape index: {}] }
   0x1   :  { %s3965_s5 = sld [smem:[%s4541_s0]]   ;;  %s3914_s14 = smov 3  }
   0x2   :  { %s3970_s9 = sld [smem:[%s4541_s0 + %s3912_s6]]   ;;  %s3915_s18 = smov 4  }
   0x3   :  { %s3975_s13 = sld [smem:[%s4541_s0 + %s3913_s10]]   ;;  %s3916_s22 = smov 5  }
   0x4   :  { %s3980_s17 = sld [smem:[%s4541_s0 + %s3914_s14]]   ;;  %s3917_s26 = smov 6  }
   0x5   :  { %s3985_s21 = sld [smem:[%s4541_s0 + %s3915_s18]]   ;;  %s3918_s30 = smov 7  }
   0x6   :  { %s3990_s25 = sld [smem:[%s4541_s0 + %s3916_s22]]   ;;  %s3919_s4 = smov 8  }
   0x7   :  { %s3995_s29 = sld [smem:[%s4541_s0 + %s3917_s26]]   ;;  %s3920_s10 = smov 9  }
   0x8   :  { %4558 = sst [smem:[#allocation2_spill]] %s3970_s9  ;;  %s3921_s15 = smov 10  }
   0x9   :  { %s4000_s3 = sld [smem:[%s4541_s0 + %s3918_s30]]   ;;  %s3922_s20 = smov 11  }
   0xa   :  { %s4005_s8 = sld [smem:[%s4541_s0 + %s3919_s4]]   ;;  %s3923_s26 = smov 12  }
   0xb   :  { %s4010_s14 = sld [smem:[%s4541_s0 + %s3920_s10]]   ;;  %s3924_s1 = smov 13  }
   0xc   :  { %s4015_s19 = sld [smem:[%s4541_s0 + %s3921_s15]]   ;;  %s3925_s7 = smov 14  }
   0xd   :  { %s4020_s24 = sld [smem:[%s4541_s0 + %s3922_s20]]   ;;  %s3926_s15 = smov 15  }
   0xe   :  { %s4025_s30 = sld [smem:[%s4541_s0 + %s3923_s26]]   ;;  %s3927_s22 = smov 16  }
   0xf   :  { %s4030_s6 = sld [smem:[%s4541_s0 + %s3924_s1]]   ;;  %s3928_s28 = smov 17  }
  0x10   :  { %s4035_s12 = sld [smem:[%s4541_s0 + %s3925_s7]]   ;;  %s3929_s7 = smov 18  }
  0x11   :  { %s4040_s20 = sld [smem:[%s4541_s0 + %s3926_s15]]   ;;  %s3930_s15 = smov 19  }
  0x12   :  { %s4045_s27 = sld [smem:[%s4541_s0 + %s3927_s22]]   ;;  %s3931_s22 = smov 20  }
  0x13   :  { %s4050_s4 = sld [smem:[%s4541_s0 + %s3928_s28]]   ;;  %s3932_s28 = smov 21  }
  0x14   :  { %s4055_s9 = sld [smem:[%s4541_s0 + %s3929_s7]]   ;;  %s3933_s7 = smov 22  }
  0x17   :  { %4559 = sst [smem:[#allocation3_spill]] %s4040_s20 }
  0x18   :  { %4560 = sst [smem:[#allocation4_spill]] %s4045_s27 }
  0x19   :  { %4561 = sst [smem:[#allocation5_spill]] %s4050_s4 }
  0x1a   :  { %4562 = sst [smem:[#allocation6_spill]] %s4055_s9 }
  0x1b   :  { %s4060_s20 = sld [smem:[%s4541_s0 + %s3930_s15]]   ;;  %s3934_s15 = smov 23  }
  0x1c   :  { %s4065_s27 = sld [smem:[%s4541_s0 + %s3931_s22]]   ;;  %s3935_s22 = smov 24  }
  0x1d   :  { %s4070_s4 = sld [smem:[%s4541_s0 + %s3932_s28]]   ;;  %s3936_s28 = smov 25  }
  0x1e   :  { %s4075_s9 = sld [smem:[%s4541_s0 + %s3933_s7]]   ;;  %s3937_s7 = smov 26  }
  0x21   :  { %4563 = sst [smem:[#allocation7_spill]] %s4060_s20 }
  0x22   :  { %4564 = sst [smem:[#allocation8_spill]] %s4065_s27 }
  0x23   :  { %4565 = sst [smem:[#allocation9_spill]] %s4070_s4 }
  0x24   :  { %4566 = sst [smem:[#allocation10_spill]] %s4075_s9 }
  0x25   :  { %s4080_s20 = sld [smem:[%s4541_s0 + %s3934_s15]]   ;;  %s3938_s15 = smov 27  }
  0x26   :  { %s4085_s27 = sld [smem:[%s4541_s0 + %s3935_s22]]   ;;  %s3939_s22 = smov 28  }
  0x27   :  { %s4090_s4 = sld [smem:[%s4541_s0 + %s3936_s28]]   ;;  %s3940_s28 = smov 29  }
  0x28   :  { %s4095_s9 = sld [smem:[%s4541_s0 + %s3937_s7]]   ;;  %s3941_s7 = smov 30  }
  0x2b   :  { %4567 = sst [smem:[#allocation11_spill]] %s4080_s20 }
  0x2c   :  { %4568 = sst [smem:[#allocation12_spill]] %s4085_s27 }
  0x2d   :  { %4569 = sst [smem:[#allocation13_spill]] %s4090_s4 }
  0x2e   :  { %4570 = sst [smem:[#allocation14_spill]] %s4095_s9 }
  0x2f   :  { %s4100_s20 = sld [smem:[%s4541_s0 + %s3938_s15]]   ;;  %s4117_s15 = smov 0  }
  0x30   :  { %s4105_s27 = sld [smem:[%s4541_s0 + %s3939_s22]]  }
  0x31   :  { %s4110_s4 = sld [smem:[%s4541_s0 + %s3940_s28]]  }
  0x32   :  { %s4115_s9 = sld [smem:[%s4541_s0 + %s3941_s7]]  }
  0x33 LB: > { %s3501_s16 = sadd.s32 4294967295, %s3910_s15   ;;  %p3505_p0 = scmp.ge.s32.totalorder %s3910_s15, 1  ;;  %s3910_s15 = sphi %s4117_s15, %s71_s15  }
  0x34   : > { %p1097_p1 = scmp.lt.s32.totalorder %s3910_s15, 4 }
  0x36   : > { %p1098_p2 = pnand %p3505_p0, %p1097_p1 }
  0x37   : > { %p1284_p3 = scmp.lt.s32.totalorder (!%p1098_p2), %s3501_s16, 2  ;;  %s3942_s26 = smov (!%p1098_p2), 120  }
  0x38   : > { %1101 = sbr.rel (%p1098_p2) target bundleno = 4227 (0x1083), region = 140  ;;  %s4554_s28 = smov (!%p1098_p2), 88  }
  0x39   : > { %s3944_s1 = smov (!%p1098_p2), 96   ;;  %s3945_s2 = smov (!%p1098_p2), 112  }
  0x3a   : > { %s4552_s7 = smov (!%p1098_p2), 80   ;;  %s4547_s10 = smov (!%p1098_p2), 72  }
  0x3b   : > { %s4556_s11 = smov (!%p1098_p2), 104  }
  0x3d   : > { %s4594_s16 = smov (!%p1284_p3, %s3501_s16), 2  ;;  %vm1429_vm0 = vcmask 261120   ;;  %vm1454_vm1 = vcmask 64512   ;;  %vm1529_vm2 = vcmask 1043456   ;;  %vm1935_vm3 = vcmask 130048  }
  0x3e   : > { %s4128_s0 = sshll.u32 %s4594_s16, 4  ;;  %s1301_s18 = scalar_lea.vmem %s3980_s17, %s4594_s16  ;;  %vm1938_vm4 = vcmask 195584   ;;  %vm2125_vm14 = vcmask 523264  }
  0x3f   : > { %s1298_s22 = scalar_lea.vmem %s3975_s13, %s4128_s0  ;;  %s1288_s23 = scalar_lea.vmem %s3965_s5, %s4128_s0  ;;  %v3804_v5 = vld [vmem:[%s1301_s18] ss:$0 sm:$0xff] }
  0x40   : > { %v3696_v0 = vld [vmem:[%s1298_s22 + $0x8] sm:$0xff]  ;;  %v3695_v1 = vld [vmem:[%s1298_s22] sm:$0xff]  ;;  %s3949_s18 = smov 64   ;;  %s3950_s22 = smov 56  }
  0x41   : > { %1439 = vmatpush.bf16.msra.mxu0 %v3696_v0  ;;  %v4136_v2 = vld [vmem:[%s1288_s23] sm:$0xff]  ;;  %v4138_v3 = vld [vmem:[%s1288_s23 + $0x8] sm:$0xff]  ;;  %s3951_s23 = smov 48  }
  0x42   : > { %v4142_v4 = vpack.c.bf16 %v4138_v3, %v4136_v2 }
  0x45   : > { %1440 = vmatpush.bf16.msra.mxu0 %v3695_v1 }
  0x48   : > { %3540 = vmatmul.msk.bf16.vlgmr.msra.gmra.mxu0 %vm1429_vm0, %v4142_v4 }
  0xc5   : > { %v1442_v6 = vpop.f32.mrf.mxu0 }
  0xc6   : > { %v1443_v7 = vadd.f32 %v3804_v5, %v1442_v6 }
  0xc8   : > { %v1447_v8 = vpack.c.bf16 %v1443_v7, %v1443_v7 }
  0xca   : > { %v1450_v9 = vunpack.c.l.b16 %v1447_v8 }
  0xcc   : > { %v4146_v10 = vpack.c.b16 %v1450_v9, %v1450_v9 }
  0xcd   : > { %v1444_v11 = vpop.f32.mrf.mxu0 }
  0xce   : > { %v1445_v12 = vadd.f32 %v3804_v5, %v1444_v11  ;;  %1567 = vrot.lane.b32.xlu2 %v4146_v10, %s3942_s26  ;;  %1569 = vrot.lane.b32.xlu1 %v4146_v10, %s4554_s28 }
  0xcf   : > { %1452 = vrot.lane.b32.xlu0 %v4146_v10, %s3944_s1 }
  0xd0   : > { %v1448_v13 = vpack.c.bf16 %v1445_v12, %v1445_v12 }
  0xd2   : > { %v1475_v14 = vunpack.c.l.b16 %v1448_v13 }
  0xd4   : > { %v4154_v15 = vpack.c.b16 %v1475_v14, %v1475_v14 }
  0xd6   : > { %1590 = vrot.lane.b32.xlu2 %v4154_v15, %s3942_s26  ;;  %1592 = vrot.lane.b32.xlu1 %v4154_v15, %s4554_s28  ;;  %s4572_s28 = sld [smem:[#allocation2_spill]] }
  0xd7   : > { %1477 = vrot.lane.b32.xlu0 %v4154_v15, %s3944_s1 }
  0xde   : > { %1681 = vrot.lane.b32.xlu2 %v4146_v10, %s3945_s2  ;;  %1706 = vrot.lane.b32.xlu1 %v4154_v15, %s4552_s7 }
  0xdf   : > { %1683 = vrot.lane.b32.xlu0 %v4146_v10, %s4552_s7 }
  0xe6   : > { %1820 = vrot.lane.b32.xlu2 %v4154_v15, %s4547_s10  ;;  %1797 = vrot.lane.b32.xlu1 %v4146_v10, %s4547_s10  ;;  %s4550_s10 = smov 24  }
  0xe7   : > { %1704 = vrot.lane.b32.xlu0 %v4154_v15, %s3945_s2 }
  0xee   : > { %1818 = vrot.lane.b32.xlu1 %v4154_v15, %s4556_s11 }
  0xef   : > { %1795 = vrot.lane.b32.xlu0 %v4146_v10, %s4556_s11  ;;  %s1293_s11 = scalar_lea.vmem %s4572_s28, %s4128_s0  ;;  %s4573_s28 = smov 104  }
 0x128   : > { %v1568_v16 = vpop.permute.xlu2 %1567 }
 0x130   : > { %v1591_v21 = vpop.permute.xlu2 %1590 }
 0x138   : > { %v1682_v26 = vpop.permute.xlu2 %1681 }
 0x140   : > { %v1570_v17 = vpop.permute.xlu1 %1569  ;;  %v1821_v31 = vpop.permute.xlu2 %1820 }
 0x141   : > { %v1453_v18 = vpop.permute.xlu0 %1452  ;;  %v1575_v19 = vsel %vm1454_vm1, %v1570_v17, 0  ;;  %v1826_v34 = vsel %vm1454_vm1, %v1821_v31, 0 }
 0x142   : > { %v1459_v20 = vsel %vm1454_vm1, %v1453_v18, 0  ;;  %1584 = vmatpush.bf16.xpose.msrb.mxu0 %v1575_v19 }
 0x143   : > { %1468 = vmatpush.bf16.xpose.msra.mxu1 %v1459_v20 }
 0x148   : > { %v1593_v22 = vpop.permute.xlu1 %1592 }
 0x149   : > { %v1478_v23 = vpop.permute.xlu0 %1477  ;;  %3545 = vmatmul.msk.bf16.vlgmr.msrb.gmra.mxu0 %vm1454_vm1, %v1568_v16  ;;  %v1598_v24 = vsel %vm1454_vm1, %v1593_v22, 0 }
 0x14a   : > { %3541 = vmatmul.msk.bf16.vlgmr.msra.gmra.mxu1 %vm1454_vm1, %v1447_v8  ;;  %v1483_v25 = vsel %vm1454_vm1, %v1478_v23, 0 }
 0x14b   : > { %1492 = vmatpush.bf16.xpose.msra.mxu2 %v1483_v25  ;;  %1607 = vmatpush.bf16.xpose.msrb.mxu1 %v1598_v24 }
 0x150   : > { %v1707_v27 = vpop.permute.xlu1 %1706 }
 0x151   : > { %v1712_v28 = vsel %vm1454_vm1, %v1707_v27, 0  ;;  %v1684_v29 = vpop.permute.xlu0 %1683 }
 0x152   : > { %v1689_v30 = vsel %vm1454_vm1, %v1684_v29, 0  ;;  %3542 = vmatmul.msk.bf16.vlgmr.msra.gmra.mxu2 %vm1454_vm1, %v1448_v13 }
 0x153   : > { %1721 = vmatpush.bf16.xpose.msra.mxu1 %v1712_v28  ;;  %1698 = vmatpush.bf16.xpose.msra.mxu0 %v1689_v30 }
 0x158   : > { %v1798_v32 = vpop.permute.xlu1 %1797 }
 0x159   : > { %v1803_v33 = vsel %vm1454_vm1, %v1798_v32, 0  ;;  %v1705_v35 = vpop.permute.xlu0 %1704 }
 0x15a   : > { %3546 = vmatmul.msk.bf16.vlgmr.msrb.gmra.mxu1 %vm1454_vm1, %v1591_v21  ;;  %3549 = vmatmul.msk.bf16.vlgmr.msra.gmra.mxu0 %vm1454_vm1, %v1682_v26 }
 0x15b   : > { %1835 = vmatpush.bf16.xpose.msrb.mxu1 %v1826_v34  ;;  %1812 = vmatpush.bf16.xpose.msrb.mxu0 %v1803_v33 }
 0x160   : > { %v1819_v37 = vpop.permute.xlu1 %1818 }
 0x161   : > { %v1796_v36 = vpop.permute.xlu0 %1795 }
 0x16a   : > { %3550 = vmatmul.msk.bf16.vlgmr.msra.gmra.mxu1 %vm1454_vm1, %v1705_v35  ;;  %3553 = vmatmul.msk.bf16.vlgmr.msrb.gmra.mxu0 %vm1454_vm1, %v1796_v36 }
 0x17a   : > { %3554 = vmatmul.msk.bf16.vlgmr.msrb.gmra.mxu1 %vm1454_vm1, %v1819_v37 }
 0x1c6   : > { %v1586_v38 = vpop.f32.mrf.mxu0 }
 0x1c7   : > { %v1470_v39 = vpop.f32.mrf.mxu1  ;;  %v1613_v40 = vmul.f32 0.35355338, %v1586_v38 }
 0x1c8   : > { %v1498_v41 = vmul.f32 0.35355338, %v1470_v39 }
 0x1c9   : > { %v1615_v42 = vsel %vm1454_vm1, %v1613_v40, -inf }
 0x1ca   : > { %1616 = vmax.xlane.f32.xlu1 %v1615_v42  ;;  %v1500_v43 = vsel %vm1454_vm1, %v1498_v41, -inf }
 0x1cb   : > { %1501 = vmax.xlane.f32.xlu2 %v1500_v43 }
 0x1ce   : > { %v1588_v44 = vpop.f32.mrf.mxu0 }
 0x1cf   : > { %v1472_v45 = vpop.f32.mrf.mxu1 }
 0x1d5   : > { %v1494_v46 = vpop.f32.mrf.mxu2 }
 0x1d6   : > { %v1499_v47 = vmul.f32 0.35355338, %v1494_v46 }
 0x1d7   : > { %v1609_v48 = vpop.f32.mrf.mxu1  ;;  %v1700_v49 = vpop.f32.mrf.mxu0 }
 0x1d8   : > { %v1614_v50 = vmul.f32 0.35355338, %v1609_v48  ;;  %v1503_v51 = vsel %vm1454_vm1, %v1499_v47, -inf  ;;  %v1727_v5 = vmul.f32 0.35355338, %v1700_v49 }
 0x1d9   : > { %1504 = vmax.xlane.f32.xlu0 %v1503_v51 }
 0x1da   : > { %v1618_v52 = vsel %vm1454_vm1, %v1614_v50, -inf  ;;  %v1729_v7 = vsel %vm1454_vm1, %v1727_v5, -inf }
 0x1db   : > { %1619 = vmax.xlane.f32.xlu2 %v1618_v52 }
 0x1dd   : > { %v1496_v53 = vpop.f32.mrf.mxu2 }
 0x1df   : > { %v1611_v54 = vpop.f32.mrf.mxu1  ;;  %v1702_v55 = vpop.f32.mrf.mxu0 }
 0x1e3   : > { %1546 = vrot.lane.b32.xlu1 %v4154_v15, %s3949_s18 }
 0x1e7   : > { %v1723_v56 = vpop.f32.mrf.mxu1  ;;  %v1814_v57 = vpop.f32.mrf.mxu0 }
 0x1e8   : > { %v1728_v63 = vmul.f32 0.35355338, %v1723_v56  ;;  %v1841_v6 = vmul.f32 0.35355338, %v1814_v57 }
 0x1ea   : > { %v1732_v1 = vsel %vm1454_vm1, %v1728_v63, -inf  ;;  %v1843_v8 = vsel %vm1454_vm1, %v1841_v6, -inf }
 0x1eb   : > { %1660 = vrot.lane.b32.xlu1 %v4154_v15, %s3950_s22 }
 0x1ed   : > { %1639 = vrot.lane.b32.xlu0 %v4146_v10, %s3950_s22  ;;  %s4549_s22 = smov 8  }
 0x1ef   : > { %v1725_v58 = vpop.f32.mrf.mxu1  ;;  %v1816_v59 = vpop.f32.mrf.mxu0 }
 0x1f3   : > { %1524 = vrot.lane.b32.xlu2 %v4146_v10, %s3949_s18  ;;  %s3952_s18 = smov 40  }
 0x1f7   : > { %v1837_v60 = vpop.f32.mrf.mxu1 }
 0x1f8   : > { %v1842_v62 = vmul.f32 0.35355338, %v1837_v60 }
 0x1fa   : > { %v1846_v0 = vsel %vm1454_vm1, %v1842_v62, -inf }
 0x1ff   : > { %v1839_v61 = vpop.f32.mrf.mxu1 }
 0x215   : > { %1847 = vmax.xlane.f32.xlu1 %v1846_v0 }
 0x217   : > { %1733 = vmax.xlane.f32.xlu0 %v1732_v1 }
 0x21c   : > { %1730 = vmax.xlane.f32.xlu2 %v1729_v7 }
 0x21f   : > { %1844 = vmax.xlane.f32.xlu0 %v1843_v8 }
 0x23d   : > { %v1617_v9 = vpop.xlane.xlu1 %1616 }
 0x23e   : > { %v1621_v11 = vsub.f32 %v1613_v40, %v1617_v9  ;;  %v1502_v12 = vpop.xlane.xlu2 %1501 }
 0x23f   : > { %v1506_v13 = vsub.f32 %v1498_v41, %v1502_v12 }
 0x240   : > { %v1623_v14 = vmul.f32 1.442695, %v1621_v11 }
 0x241   : > { %v1508_v16 = vmul.f32 1.442695, %v1506_v13 }
 0x242   : > { %3822 = vpow2.f32 %v1623_v14 }
 0x243   : > { %3824 = vpow2.f32 %v1508_v16 }
 0x248   : > { %v4206_v17 = vpop.eup %3822 }
 0x249   : > { %v4208_v18 = vpop.eup %3824  ;;  %v1627_v19 = vsel %vm1454_vm1, %v4206_v17, 0.0 }
 0x24a   : > { %v1512_v20 = vsel %vm1454_vm1, %v4208_v18, 0.0  ;;  %1628 = vadd.xlane.f32.xlu0 %v1627_v19 }
 0x24b   : > { %1513 = vadd.xlane.f32.xlu1 %v1512_v20 }
 0x24c   : > { %v1505_v21 = vpop.xlane.xlu0 %1504 }
 0x24d   : > { %v1507_v22 = vsub.f32 %v1499_v47, %v1505_v21 }
 0x24e   : > { %v1620_v23 = vpop.xlane.xlu2 %1619 }
 0x24f   : > { %v1510_v24 = vmul.f32 1.442695, %v1507_v22  ;;  %v1622_v25 = vsub.f32 %v1614_v50, %v1620_v23 }
 0x251   : > { %3826 = vpow2.f32 %v1510_v24  ;;  %v1625_v26 = vmul.f32 1.442695, %v1622_v25 }
 0x253   : > { %3828 = vpow2.f32 %v1625_v26 }
 0x255   : > { %v1547_v27 = vpop.permute.xlu1 %1546 }
 0x256   : > { %v1525_v28 = vpop.permute.xlu2 %1524  ;;  %v1552_v29 = vsel %vm1529_vm2, %v1547_v27, 0 }
 0x257   : > { %v4215_v30 = vpop.eup %3826  ;;  %v1531_v31 = vsel %vm1529_vm2, %v1525_v28, 0 }
 0x258   : > { %1540 = vmatpush.bf16.msra.mxu3 %v1531_v31  ;;  %v1515_v32 = vsel %vm1454_vm1, %v4215_v30, 0.0 }
 0x259   : > { %v4220_v33 = vpop.eup %3828  ;;  %1516 = vadd.xlane.f32.xlu0 %v1515_v32 }
 0x25a   : > { %v1630_v34 = vsel %vm1454_vm1, %v4220_v33, 0.0 }
 0x25b   : > { %1631 = vadd.xlane.f32.xlu2 %v1630_v34 }
 0x25c   : > { %1561 = vmatpush.bf16.msrb.mxu3 %v1552_v29 }
 0x25d   : > { %v1661_v37 = vpop.permute.xlu1 %1660 }
 0x25f   : > { %v1640_v35 = vpop.permute.xlu0 %1639 }
 0x260   : > { %v1645_v36 = vsel %vm1529_vm2, %v1640_v35, 0 }
 0x261   : > { %1654 = vmatpush.bf16.msrb.mxu2 %v1645_v36 }
 0x264   : > { %1774 = vrot.lane.b32.xlu1 %v4154_v15, %s3951_s23 }
 0x273   : > { %1753 = vrot.lane.b32.xlu2 %v4146_v10, %s3951_s23  ;;  %s4551_s23 = smov 16  }
 0x288   : > { %v1848_v38 = vpop.xlane.xlu1 %1847 }
 0x289   : > { %v1850_v39 = vsub.f32 %v1842_v62, %v1848_v38 }
 0x28a   : > { %v1734_v40 = vpop.xlane.xlu0 %1733 }
 0x28b   : > { %v1736_v41 = vsub.f32 %v1728_v63, %v1734_v40  ;;  %v1853_v43 = vmul.f32 1.442695, %v1850_v39 }
 0x28d   : > { %v1739_v42 = vmul.f32 1.442695, %v1736_v41 }
 0x28f   : > { %3830 = vpow2.f32 %v1739_v42  ;;  %v1731_v44 = vpop.xlane.xlu2 %1730 }
 0x290   : > { %v1735_v45 = vsub.f32 %v1727_v5, %v1731_v44  ;;  %3832 = vpow2.f32 %v1853_v43  ;;  %v1666_v5 = vsel %vm1529_vm2, %v1661_v37, 0 }
 0x292   : > { %v1737_v46 = vmul.f32 1.442695, %v1735_v45  ;;  %v1845_v47 = vpop.xlane.xlu0 %1844 }
 0x293   : > { %v1849_v48 = vsub.f32 %v1841_v6, %v1845_v47 }
 0x294   : > { %3834 = vpow2.f32 %v1737_v46 }
 0x295   : > { %v3831_v49 = vpop.eup %3830  ;;  %v1851_v50 = vmul.f32 1.442695, %v1849_v48 }
 0x296   : > { %v1744_v51 = vsel %vm1454_vm1, %v3831_v49, 0.0  ;;  %v4228_v52 = vpop.eup %3832 }
 0x297   : > { %3836 = vpow2.f32 %v1851_v50  ;;  %1745 = vadd.xlane.f32.xlu0 %v1744_v51  ;;  %v1858_v55 = vsel %vm1454_vm1, %v4228_v52, 0.0 }
 0x29a   : > { %v3835_v53 = vpop.eup %3834 }
 0x29b   : > { %v1741_v54 = vsel %vm1454_vm1, %v3835_v53, 0.0 }
 0x29c   : > { %1742 = vadd.xlane.f32.xlu1 %v1741_v54  ;;  %1859 = vadd.xlane.f32.xlu2 %v1858_v55 }
 0x29d   : > { %v3837_v56 = vpop.eup %3836 }
 0x29e   : > { %v1855_v57 = vsel %vm1454_vm1, %v3837_v56, 0.0 }
 0x29f   : > { %1856 = vadd.xlane.f32.xlu0 %v1855_v57 }
 0x2b3   : > { %1867 = vrot.lane.b32.xlu0 %v4146_v10, %s3952_s18 }
 0x2b5   : > { %1888 = vrot.lane.b32.xlu1 %v4154_v15, %s3952_s18  ;;  %s1309_s18 = scalar_lea.vmem %s3990_s25, %s4594_s16 }
 0x2bd   : > { %v1629_v58 = vpop.xlane.xlu0 %1628 }
 0x2be   : > { %v1514_v59 = vpop.xlane.xlu1 %1513  ;;  %3838 = vrcp.f32 %v1629_v58 }
 0x2bf   : > { %3840 = vrcp.f32 %v1514_v59 }
 0x2c4   : > { %v3839_v60 = vpop.eup %3838 }
 0x2c5   : > { %v3841_v61 = vpop.eup %3840  ;;  %v1635_v62 = vmul.f32 %v3839_v60, %v4206_v17 }
 0x2c6   : > { %v1520_v63 = vmul.f32 %v3841_v61, %v4208_v18 }
 0x2c7   : > { %v1637_v0 = vpack.c.bf16 %v1635_v62, %v1635_v62 }
 0x2c8   : > { %v1522_v1 = vpack.c.bf16 %v1520_v63, %v1520_v63 }
 0x2c9   : > { %3547 = vmatmul.msk.bf16.vlgmr.msrb.gmra.mxu2 %vm1454_vm1, %v1637_v0 }
 0x2ca   : > { %3543 = vmatmul.msk.bf16.vlgmr.msra.gmra.mxu3 %vm1454_vm1, %v1522_v1 }
 0x2cb   : > { %1675 = vmatpush.bf16.msra.mxu3 %v1666_v5 }
 0x2cc   : > { %v1517_v10 = vpop.xlane.xlu0 %1516 }
 0x2cd   : > { %3842 = vrcp.f32 %v1517_v10 }
 0x2ce   : > { %v1632_v15 = vpop.xlane.xlu2 %1631 }
 0x2cf   : > { %3844 = vrcp.f32 %v1632_v15 }
 0x2d3   : > { %v3843_v6 = vpop.eup %3842 }
 0x2d4   : > { %v1521_v7 = vmul.f32 %v3843_v6, %v4215_v30 }
 0x2d5   : > { %v3845_v14 = vpop.eup %3844 }
 0x2d6   : > { %v1754_v8 = vpop.permute.xlu2 %1753  ;;  %v1775_v11 = vpop.permute.xlu1 %1774  ;;  %v1523_v12 = vpack.c.bf16 %v1521_v7, %v1521_v7  ;;  %v1636_v16 = vmul.f32 %v3845_v14, %v4220_v33 }
 0x2d7   : > { %v1759_v9 = vsel %vm1529_vm2, %v1754_v8, 0  ;;  %v1780_v13 = vsel %vm1529_vm2, %v1775_v11, 0 }
 0x2d8   : > { %1768 = vmatpush.bf16.msra.mxu2 %v1759_v9  ;;  %v1638_v17 = vpack.c.bf16 %v1636_v16, %v1636_v16 }
 0x2da   : > { %3544 = vmatmul.msk.bf16.vlgmr.msrb.gmra.mxu3 %vm1454_vm1, %v1523_v12 }
 0x2db   : > { %1789 = vmatpush.bf16.msrb.mxu3 %v1780_v13  ;;  %v3805_v13 = vld [vmem:[%s1309_s18] ss:$0 sm:$0xff]  ;;  %s1323_s18 = scalar_lea.vmem %s4010_s14, %s4594_s16 }
 0x2ea   : > { %3548 = vmatmul.msk.bf16.vlgmr.msra.gmra.mxu3 %vm1454_vm1, %v1638_v17 }
 0x30a   : > { %v1746_v18 = vpop.xlane.xlu0 %1745 }
 0x30b   : > { %3846 = vrcp.f32 %v1746_v18 }
 0x30f   : > { %v1743_v19 = vpop.xlane.xlu1 %1742  ;;  %v1860_v25 = vpop.xlane.xlu2 %1859 }
 0x310   : > { %3848 = vrcp.f32 %v1743_v19 }
 0x311   : > { %v3847_v20 = vpop.eup %3846  ;;  %3850 = vrcp.f32 %v1860_v25 }
 0x312   : > { %v1750_v21 = vmul.f32 %v3847_v20, %v3831_v49  ;;  %v1857_v27 = vpop.xlane.xlu0 %1856 }
 0x313   : > { %3852 = vrcp.f32 %v1857_v27 }
 0x314   : > { %v1752_v22 = vpack.c.bf16 %v1750_v21, %v1750_v21 }
 0x316   : > { %3552 = vmatmul.msk.bf16.vlgmr.msrb.gmra.mxu3 %vm1454_vm1, %v1752_v22  ;;  %v3849_v23 = vpop.eup %3848 }
 0x317   : > { %v1749_v24 = vmul.f32 %v3849_v23, %v3835_v53  ;;  %v3851_v28 = vpop.eup %3850  ;;  %v3956_v23 = vmov 32.0  }
 0x318   : > { %v1864_v31 = vmul.f32 %v3851_v28, %v4228_v52  ;;  %3854 = vrcp.f32 %v3956_v23 }
 0x319   : > { %v1751_v26 = vpack.c.bf16 %v1749_v24, %v1749_v24  ;;  %v3853_v29 = vpop.eup %3852 }
 0x31a   : > { %v1863_v32 = vmul.f32 %v3853_v29, %v3837_v56  ;;  %v1866_v36 = vpack.c.bf16 %v1864_v31, %v1864_v31 }
 0x31b   : > { %3551 = vmatmul.msk.bf16.vlgmr.msra.gmra.mxu2 %vm1454_vm1, %v1751_v26 }
 0x31c   : > { %v1865_v37 = vpack.c.bf16 %v1863_v32, %v1863_v32 }
 0x31e   : > { %v3855_v24 = vpop.eup %3854 }
 0x31f   : > { %v1988_v25 = vmul.f32 32.0, %v3855_v24  ;;  %vm1992_vm5 = vweird.f32 %v3855_v24 }
 0x321   : > { %v1989_v26 = vsub.f32 1.0, %v1988_v25 }
 0x323   : > { %v1990_v27 = vmul.f32 %v3855_v24, %v1989_v26 }
 0x325   : > { %v1868_v30 = vpop.permute.xlu0 %1867 }
 0x326   : > { %v1873_v33 = vsel %vm1529_vm2, %v1868_v30, 0 }
 0x327   : > { %v1889_v34 = vpop.permute.xlu1 %1888  ;;  %1882 = vmatpush.bf16.msrb.mxu2 %v1873_v33 }
 0x328   : > { %v1894_v35 = vsel %vm1529_vm2, %v1889_v34, 0 }
 0x329   : > { %1903 = vmatpush.bf16.msra.mxu3 %v1894_v35 }
 0x32b   : > { %3555 = vmatmul.msk.bf16.vlgmr.msrb.gmra.mxu2 %vm1454_vm1, %v1865_v37 }
 0x32c   : > { %3556 = vmatmul.msk.bf16.vlgmr.msra.gmra.mxu3 %vm1454_vm1, %v1866_v36 }
 0x34c   : > { %v1656_v38 = vpop.f32.mrf.mxu2 }
 0x34d   : > { %v1542_v39 = vpop.f32.mrf.mxu3 }
 0x354   : > { %v1658_v40 = vpop.f32.mrf.mxu2 }
 0x355   : > { %v1544_v41 = vpop.f32.mrf.mxu3 }
 0x35d   : > { %v1563_v42 = vpop.f32.mrf.mxu3 }
 0x365   : > { %v1565_v43 = vpop.f32.mrf.mxu3 }
 0x36d   : > { %v1677_v44 = vpop.f32.mrf.mxu3 }
 0x36e   : > { %v3774_v45 = vpack.i.bf16 %v1677_v44, %v1656_v38 }
 0x370   : > { %3775 = vrot.lane.b32.xlu0 %v3774_v45, %s4549_s22  ;;  %s1306_s22 = scalar_lea.vmem %s3985_s21, %s4128_s0 }
 0x371   : > { %v3698_v57 = vld [vmem:[%s1306_s22 + $0x8] sm:$0xff]  ;;  %v3697_v58 = vld [vmem:[%s1306_s22] sm:$0xff]  ;;  %s1312_s22 = scalar_lea.vmem %s3995_s29, %s4594_s16 }
 0x372   : > { %1971 = vmatpush.bf16.msra.mxu0 %v3698_v57 }
 0x375   : > { %v1679_v46 = vpop.f32.mrf.mxu3 }
 0x376   : > { %1972 = vmatpush.bf16.msra.mxu0 %v3697_v58  ;;  %v3806_v58 = vld [vmem:[%s1312_s22] ss:$0 sm:$0xff]  ;;  %s4301_s22 = sshll.u32 %s4594_s16, 5 }
 0x377   : > { %s1328_s7 = scalar_lea.vmem %s4015_s19, %s4301_s22 }
 0x399   : > { %v1791_v47 = vpop.f32.mrf.mxu3 }
 0x39e   : > { %v1770_v48 = vpop.f32.mrf.mxu2 }
 0x39f   : > { %v3779_v49 = vpack.i.bf16 %v1791_v47, %v1770_v48 }
 0x3a1   : > { %v1793_v50 = vpop.f32.mrf.mxu3  ;;  %3780 = vrot.lane.b32.xlu1 %v3779_v49, %s4551_s23  ;;  %s1320_s23 = scalar_lea.vmem %s4005_s8, %s4128_s0 }
 0x3a2   : > { %v3700_v38 = vld [vmem:[%s1320_s23 + $0x8] sm:$0xff] }
 0x3a3   : > { %2074 = vmatpush.bf16.msra.mxu1 %v3700_v38 }
 0x3a6   : > { %v1772_v51 = vpop.f32.mrf.mxu2 }
 0x3ae   : > { %v1884_v52 = vpop.f32.mrf.mxu2 }
 0x3af   : > { %v1905_v53 = vpop.f32.mrf.mxu3 }
 0x3b0   : > { %v3784_v54 = vpack.i.bf16 %v1905_v53, %v1884_v52 }
 0x3b2   : > { %3785 = vrot.lane.b32.xlu0 %v3784_v54, %s4550_s10  ;;  %s1315_s10 = scalar_lea.vmem %s4000_s3, %s4594_s16 }
 0x3b6   : > { %v1886_v55 = vpop.f32.mrf.mxu2 }
 0x3b7   : > { %v1907_v56 = vpop.f32.mrf.mxu3 }
 0x3e2   : > { %v3776_v59 = vpop.permute.xlu0 %3775 }
 0x3e3   : > { %v3778_v61 = vunpack.i.h.bf16 %v3776_v59  ;;  %v3777_v62 = vunpack.i.l.bf16 %v3776_v59 }
 0x3e5   : > { %v1934_v5 = vsel %vm1454_vm1, %v1563_v42, %v3778_v61  ;;  %v1933_v10 = vsel %vm1454_vm1, %v1542_v39, %v3777_v62  ;;  %v3699_v42 = vld [vmem:[%s1320_s23] sm:$0xff]  ;;  %s1331_s23 = scalar_lea.vmem %s4020_s24, %s4594_s16 }
 0x3e6   : > { %2075 = vmatpush.bf16.msra.mxu1 %v3699_v42  ;;  %v3807_v62 = vld [vmem:[%s1315_s10] ss:$0 sm:$0xff]  ;;  %s1337_s10 = scalar_lea.vmem %s4030_s6, %s4594_s16 }
 0x413   : > { %v3781_v60 = vpop.permute.xlu1 %3780 }
 0x414   : > { %v3783_v63 = vunpack.i.h.bf16 %v3781_v60  ;;  %v3782_v0 = vunpack.i.l.bf16 %v3781_v60 }
 0x416   : > { %v1936_v7 = vsel %vm1935_vm3, %v1933_v10, %v3782_v0  ;;  %v1937_v8 = vsel %vm1935_vm3, %v1934_v5, %v3783_v63 }
 0x424   : > { %v3786_v1 = vpop.permute.xlu0 %3785 }
 0x425   : > { %v3788_v15 = vunpack.i.h.bf16 %v3786_v1  ;;  %v3787_v6 = vunpack.i.l.bf16 %v3786_v1 }
 0x427   : > { %v1939_v9 = vsel %vm1938_vm4, %v1936_v7, %v3787_v6  ;;  %v1940_v11 = vsel %vm1938_vm4, %v1937_v8, %v3788_v15  ;;  %v3704_v6 = vld [vmem:[%s1328_s7 + $0x18] sm:$0xff]  ;;  %v3703_v7 = vld [vmem:[%s1328_s7 + $0x10] sm:$0xff]  ;;  %v3702_v8 = vld [vmem:[%s1328_s7 + $0x8] sm:$0xff] }
 0x428   : > { %v1945_v12 = vpack.c.bf16 %v1940_v11, %v1939_v9  ;;  %2133 = vmatpush.bf16.msra.mxu2 %v3704_v6  ;;  %v3701_v9 = vld [vmem:[%s1328_s7] sm:$0xff]  ;;  %s1334_s7 = scalar_lea.vmem %s4025_s30, %s4594_s16 }
 0x42a   : > { %3565 = vmatmul.msk.bf16.vlgmr.msra.gmra.mxu0 %vm1429_vm0, %v1945_v12  ;;  %v3808_v12 = vld [vmem:[%s1323_s18] ss:$0 sm:$0xff]  ;;  %s1342_s18 = scalar_lea.vmem %s4035_s12, %s4128_s0 }
 0x42c   : > { %2134 = vmatpush.bf16.msra.mxu2 %v3703_v7  ;;  %v3811_v7 = vld [vmem:[%s1337_s10] ss:$0 sm:$0xff]  ;;  %s4579_s10 = sld [smem:[#allocation4_spill]] }
 0x430   : > { %2135 = vmatpush.bf16.msra.mxu2 %v3702_v8 }
 0x434   : > { %2136 = vmatpush.bf16.msra.mxu2 %v3701_v9 }
 0x4a7   : > { %v1974_v14 = vpop.f32.mrf.mxu0 }
 0x4a8   : > { %v1975_v16 = vadd.f32 %v3805_v13, %v1974_v14 }
 0x4aa   : > { %v1979_v17 = vadd.f32 %v1975_v16, %v4136_v2  ;;  %v1991_v2 = vadd.f32 %v3855_v24, %v1990_v27 }
 0x4ac   : > { %v1981_v18 = vsel %vm1429_vm0, %v1979_v17, 0.0  ;;  %v4279_v28 = vsel %vm1992_vm5, %v3855_v24, %v1991_v2 }
 0x4ad   : > { %1982 = vadd.xlane.f32.xlu1 %v1981_v18 }
 0x4af   : > { %v1976_v19 = vpop.f32.mrf.mxu0 }
 0x4b0   : > { %v1977_v20 = vadd.f32 %v3805_v13, %v1976_v19 }
 0x4b2   : > { %v1980_v21 = vadd.f32 %v1977_v20, %v4138_v3 }
 0x4b4   : > { %v1984_v22 = vsel %vm1429_vm0, %v1980_v21, 0.0 }
 0x4b5   : > { %1985 = vadd.xlane.f32.xlu2 %v1984_v22  ;;  %v3809_v22 = vld [vmem:[%s1331_s23] ss:$0 sm:$0xff]  ;;  %s4571_s23 = sld [smem:[#allocation3_spill]] }
 0x520   : > { %v1983_v29 = vpop.xlane.xlu1 %1982 }
 0x521   : > { %v1994_v3 = vmul.f32 %v4279_v28, %v1983_v29 }
 0x523   : > { %v1996_v30 = vsub.f32 %v1979_v17, %v1994_v3 }
 0x525   : > { %v1998_v31 = vmul.f32 %v1996_v30, %v1996_v30 }
 0x527   : > { %v2000_v32 = vsel %vm1429_vm0, %v1998_v31, 0.0  ;;  %v3706_v31 = vld [vmem:[%s1342_s18 + $0x8] sm:$0xff] }
 0x528   : > { %v1986_v33 = vpop.xlane.xlu2 %1985  ;;  %2001 = vadd.xlane.f32.xlu0 %v2000_v32  ;;  %2231 = vmatpush.bf16.msrb.mxu3 %v3706_v31 }
 0x529   : > { %v1995_v34 = vmul.f32 %v4279_v28, %v1986_v33 }
 0x52b   : > { %v1997_v35 = vsub.f32 %v1980_v21, %v1995_v34 }
 0x52d   : > { %v1999_v36 = vmul.f32 %v1997_v35, %v1997_v35 }
 0x52f   : > { %v2003_v37 = vsel %vm1429_vm0, %v1999_v36, 0.0 }
 0x530   : > { %2004 = vadd.xlane.f32.xlu2 %v2003_v37 }
 0x59b   : > { %v2002_v39 = vpop.xlane.xlu0 %2001 }
 0x59c   : > { %v2006_v40 = vmul.f32 %v2002_v39, %v4279_v28 }
 0x59e   : > { %v2008_v41 = vadd.f32 1e-05, %v2006_v40 }
 0x5a0   : > { %3856 = vrsqrt.f32 %v2008_v41  ;;  %vm2016_vm7 = vweird.f32 %v2008_v41 }
 0x5a3   : > { %v2005_v43 = vpop.xlane.xlu2 %2004 }
 0x5a4   : > { %v2007_v44 = vmul.f32 %v2005_v43, %v4279_v28 }
 0x5a6   : > { %v3857_v45 = vpop.eup %3856  ;;  %v2009_v46 = vadd.f32 1e-05, %v2007_v44 }
 0x5a7   : > { %v2011_v47 = vmul.f32 %v3857_v45, %v2008_v41  ;;  %vm2017_vm6 = vweird.f32 %v3857_v45 }
 0x5a8   : > { %3858 = vrsqrt.f32 %v2009_v46  ;;  %vm2018_vm8 = vmor %vm2016_vm7, %vm2017_vm6  ;;  %vm2026_vm10 = vweird.f32 %v2009_v46 }
 0x5a9   : > { %v2012_v48 = vmul.f32 %v3857_v45, %v2011_v47 }
 0x5ab   : > { %v2013_v49 = vmul.f32 0.5, %v2012_v48 }
 0x5ad   : > { %v2014_v50 = vsub.f32 1.5, %v2013_v49  ;;  %v1406_v49 = vld [vmem:[%s1293_s11] sm:$0xff] }
 0x5ae   : > { %v3859_v51 = vpop.eup %3858 }
 0x5af   : > { %v2015_v52 = vmul.f32 %v3857_v45, %v2014_v50  ;;  %v2021_v53 = vmul.f32 %v3859_v51, %v2009_v46  ;;  %vm2027_vm9 = vweird.f32 %v3859_v51  ;;  %v1407_v50 = vld [vmem:[%s1293_s11 + $0x8] sm:$0xff]  ;;  %s4577_s11 = sld [smem:[#allocation5_spill]] }
 0x5b0   : > { %vm2028_vm11 = vmor %vm2026_vm10, %vm2027_vm9 }
 0x5b1   : > { %v2022_v54 = vmul.f32 %v3859_v51, %v2021_v53  ;;  %v2019_v55 = vsel %vm2018_vm8, %v3857_v45, %v2015_v52 }
 0x5b2   : > { %v2030_v59 = vmul.f32 %v2019_v55, %v1996_v30  ;;  %v3705_v30 = vld [vmem:[%s1342_s18] sm:$0xff]  ;;  %s1345_s18 = scalar_lea.vmem %s4571_s23, %s4594_s16  ;;  %v2239_v55 = vpack.c.bf16 %v1407_v50, %v1406_v49  ;;  %s4580_s23 = smov 16  }
 0x5b3   : > { %v2023_v56 = vmul.f32 0.5, %v2022_v54  ;;  %2240 = vrot.lane.b32.xlu0 %v3705_v30, %s3944_s1  ;;  %2232 = vmatpush.bf16.msrb.mxu3 %v3705_v30  ;;  %v4325_v42 = vld [vmem:[%s1345_s18] ss:$0 sm:$0xff] }
 0x5b4   : > { %v2036_v63 = vmul.f32 %v3806_v58, %v2030_v59 }
 0x5b5   : > { %v2024_v57 = vsub.f32 1.5, %v2023_v56  ;;  %s1353_s18 = scalar_lea.vmem %s4577_s11, %s4594_s16 }
 0x5b6   : > { %v2042_v5 = vadd.f32 %v3807_v62, %v2036_v63 }
 0x5b7   : > { %v2025_v60 = vmul.f32 %v3859_v51, %v2024_v57 }
 0x5b9   : > { %v2029_v61 = vsel %vm2028_vm11, %v3859_v51, %v2025_v60 }
 0x5ba   : > { %v2031_v0 = vmul.f32 %v2029_v61, %v1997_v35 }
 0x5bc   : > { %v2037_v1 = vmul.f32 %v3806_v58, %v2031_v0 }
 0x5be   : > { %v2043_v10 = vadd.f32 %v3807_v62, %v2037_v1 }
 0x5c0   : > { %v2048_v15 = vpack.c.bf16 %v2043_v10, %v2042_v5 }
 0x5c2   : > { %3574 = vmatmul.msk.bf16.vlgmr.msra.gmra.mxu1 %vm1429_vm0, %v2048_v15 }
 0x625   : > { %v2241_v51 = vpop.permute.xlu0 %2240 }
 0x63f   : > { %v2077_v11 = vpop.f32.mrf.mxu1 }
 0x640   : > { %v2078_v13 = vadd.f32 %v3808_v12, %v2077_v11 }
 0x642   : > { %v2084_v16 = vmul.f32 0.01, %v2078_v13  ;;  %vm2082_vm12 = vcmp.ge.f32.partialorder %v2078_v13, 0.0 }
 0x644   : > { %v2086_v19 = vsel %vm2082_vm12, %v2078_v13, %v2084_v16 }
 0x647   : > { %v2079_v14 = vpop.f32.mrf.mxu1 }
 0x648   : > { %v2080_v17 = vadd.f32 %v3808_v12, %v2079_v14 }
 0x64a   : > { %vm2083_vm13 = vcmp.ge.f32.partialorder %v2080_v17, 0.0  ;;  %v2085_v18 = vmul.f32 0.01, %v2080_v17 }
 0x64c   : > { %v2087_v20 = vsel %vm2083_vm13, %v2080_v17, %v2085_v18 }
 0x64d   : > { %v2096_v21 = vpack.c.bf16 %v2087_v20, %v2086_v19 }
 0x64f   : > { %3591 = vmatmul.msk.bf16.vlgmr.msra.gmra.mxu2 %vm2125_vm14, %v2096_v21 }
 0x6d2   : > { %v2138_v23 = vpop.f32.mrf.mxu2 }
 0x6d3   : > { %v2139_v24 = vadd.f32 %v3809_v22, %v2138_v23 }
 0x6d5   : > { %v2143_v25 = vadd.f32 %v2139_v24, %v2042_v5  ;;  %v3810_v5 = vld [vmem:[%s1334_s7] ss:$0 sm:$0xff]  ;;  %s4578_s7 = smov 8  }
 0x6d7   : > { %v2145_v26 = vsel %vm1429_vm0, %v2143_v25, 0.0 }
 0x6d8   : > { %2146 = vadd.xlane.f32.xlu2 %v2145_v26 }
 0x6da   : > { %v2140_v27 = vpop.f32.mrf.mxu2 }
 0x6db   : > { %v2141_v2 = vadd.f32 %v3809_v22, %v2140_v27 }
 0x6dd   : > { %v2144_v29 = vadd.f32 %v2141_v2, %v2043_v10 }
 0x6df   : > { %v2148_v3 = vsel %vm1429_vm0, %v2144_v29, 0.0 }
 0x6e0   : > { %2149 = vadd.xlane.f32.xlu2 %v2148_v3 }
 0x74b   : > { %v2147_v32 = vpop.xlane.xlu2 %2146 }
 0x74c   : > { %v2151_v33 = vmul.f32 %v2147_v32, %v4279_v28 }
 0x74e   : > { %v2153_v34 = vsub.f32 %v2143_v25, %v2151_v33 }
 0x750   : > { %v2155_v35 = vmul.f32 %v2153_v34, %v2153_v34 }
 0x752   : > { %v2157_v36 = vsel %vm1429_vm0, %v2155_v35, 0.0 }
 0x753   : > { %2158 = vadd.xlane.f32.xlu2 %v2157_v36  ;;  %v2150_v37 = vpop.xlane.xlu2 %2149 }
 0x754   : > { %v2152_v38 = vmul.f32 %v2150_v37, %v4279_v28 }
 0x756   : > { %v2154_v39 = vsub.f32 %v2144_v29, %v2152_v38 }
 0x758   : > { %v2156_v40 = vmul.f32 %v2154_v39, %v2154_v39 }
 0x75a   : > { %v2160_v41 = vsel %vm1429_vm0, %v2156_v40, 0.0 }
 0x75b   : > { %2161 = vadd.xlane.f32.xlu1 %v2160_v41 }
 0x76b   : > { %2242 = vrot.lane.b32.xlu2 %v3706_v31, %s3944_s1 }
 0x774   : > { %2246 = vrot.lane.b32.xlu1 %v4325_v42, %s3944_s1 }
 0x7c6   : > { %v2159_v43 = vpop.xlane.xlu2 %2158 }
 0x7c7   : > { %v2163_v44 = vmul.f32 %v2159_v43, %v4279_v28 }
 0x7c9   : > { %v2165_v45 = vadd.f32 1e-05, %v2163_v44 }
 0x7cb   : > { %3860 = vrsqrt.f32 %v2165_v45  ;;  %vm2173_vm5 = vweird.f32 %v2165_v45 }
 0x7ce   : > { %v2162_v46 = vpop.xlane.xlu1 %2161  ;;  %v2243_v47 = vpop.permute.xlu2 %2242 }
 0x7cf   : > { %v2164_v48 = vmul.f32 %v2162_v46, %v4279_v28  ;;  %2258 = vmatpush.bf16.msrb.mxu0 %v2243_v47 }
 0x7d1   : > { %v3861_v52 = vpop.eup %3860  ;;  %v2166_v53 = vadd.f32 1e-05, %v2164_v48 }
 0x7d2   : > { %v2168_v54 = vmul.f32 %v3861_v52, %v2165_v45  ;;  %vm2174_vm15 = vweird.f32 %v3861_v52 }
 0x7d3   : > { %3862 = vrsqrt.f32 %v2166_v53  ;;  %2259 = vmatpush.bf16.msrb.mxu0 %v2241_v51  ;;  %vm2175_vm6 = vmor %vm2173_vm5, %vm2174_vm15  ;;  %vm2183_vm8 = vweird.f32 %v2166_v53 }
 0x7d4   : > { %v2169_v56 = vmul.f32 %v3861_v52, %v2168_v54 }
 0x7d6   : > { %v2170_v57 = vmul.f32 0.5, %v2169_v56  ;;  %3601 = vmatmul.msk.bf16.vlgmr.msrb.gmra.mxu0 %vm1429_vm0, %v2239_v55 }
 0x7d8   : > { %v2171_v58 = vsub.f32 1.5, %v2170_v57 }
 0x7d9   : > { %v3863_v59 = vpop.eup %3862 }
 0x7da   : > { %v2172_v60 = vmul.f32 %v3861_v52, %v2171_v58  ;;  %v2178_v61 = vmul.f32 %v3863_v59, %v2166_v53  ;;  %vm2184_vm7 = vweird.f32 %v3863_v59 }
 0x7db   : > { %vm2185_vm9 = vmor %vm2183_vm8, %vm2184_vm7 }
 0x7dc   : > { %v2179_v62 = vmul.f32 %v3863_v59, %v2178_v61  ;;  %v2176_v63 = vsel %vm2175_vm6, %v3861_v52, %v2172_v60 }
 0x7dd   : > { %v2187_v10 = vmul.f32 %v2176_v63, %v2153_v34 }
 0x7de   : > { %v2180_v0 = vmul.f32 0.5, %v2179_v62 }
 0x7df   : > { %v2193_v8 = vmul.f32 %v3810_v5, %v2187_v10 }
 0x7e0   : > { %v2181_v1 = vsub.f32 1.5, %v2180_v0 }
 0x7e1   : > { %v4340_v12 = vadd.f32 %v3811_v7, %v2193_v8 }
 0x7e2   : > { %v2182_v15 = vmul.f32 %v3863_v59, %v2181_v1 }
 0x7e4   : > { %v2186_v6 = vsel %vm2185_vm9, %v3863_v59, %v2182_v15 }
 0x7e5   : > { %v2188_v9 = vmul.f32 %v2186_v6, %v2154_v39 }
 0x7e6   : > { %v2247_v16 = vpop.permute.xlu1 %2246 }
 0x7e7   : > { %v2194_v11 = vmul.f32 %v3810_v5, %v2188_v9 }
 0x7e9   : > { %v4342_v13 = vadd.f32 %v3811_v7, %v2194_v11 }
 0x7eb   : > { %v2206_v14 = vpack.c.bf16 %v4342_v13, %v4340_v12 }
 0x7ed   : > { %3600 = vmatmul.msk.bf16.vlgmr.msrb.gmra.mxu3 %vm1429_vm0, %v2206_v14 }
 0x853   : > { %v2261_v17 = vpop.f32.mrf.mxu0 }
 0x854   : > { %v2262_v18 = vadd.f32 %v2261_v17, %v2247_v16 }
 0x856   : > { %v2268_v19 = vpack.c.bf16 %v2262_v18, %v2262_v18 }
 0x858   : > { %v2274_v20 = vsel %vm1454_vm1, %v2268_v19, 0  ;;  %v2335_v21 = vunpack.c.l.b16 %v2268_v19 }
 0x859   : > { %2283 = vmatpush.bf16.xpose.msrb.mxu1 %v2274_v20 }
 0x85a   : > { %v4348_v22 = vpack.c.b16 %v2335_v21, %v2335_v21 }
 0x85b   : > { %v2263_v23 = vpop.f32.mrf.mxu0 }
 0x85c   : > { %2387 = vrot.lane.b32.xlu0 %v4348_v22, %s3942_s26  ;;  %v2264_v24 = vadd.f32 %v2263_v23, %v2247_v16 }
 0x85e   : > { %v2269_v25 = vpack.c.bf16 %v2264_v24, %v2264_v24 }
 0x860   : > { %v2293_v26 = vsel %vm1454_vm1, %v2269_v25, 0  ;;  %v2359_v27 = vunpack.c.l.b16 %v2269_v25 }
 0x861   : > { %2302 = vmatpush.bf16.xpose.msrb.mxu2 %v2293_v26 }
 0x862   : > { %v4353_v2 = vpack.c.b16 %v2359_v27, %v2359_v27 }
 0x864   : > { %2413 = vrot.lane.b32.xlu2 %v4353_v2, %s3942_s26 }
 0x86c   : > { %2504 = vrot.lane.b32.xlu2 %v4348_v22, %s3945_s2 }
 0x870   : > { %v2234_v29 = vpop.f32.mrf.mxu3 }
 0x871   : > { %v2235_v3 = vadd.f32 %v4325_v42, %v2234_v29 }
 0x873   : > { %v2266_v30 = vpack.c.bf16 %v2235_v3, %v2235_v3 }
 0x875   : > { %v2383_v31 = vunpack.c.l.b16 %v2266_v30  ;;  %3602 = vmatmul.msk.bf16.vlgmr.msrb.gmra.mxu1 %vm1454_vm1, %v2266_v30 }
 0x877   : > { %v2384_v32 = vpack.c.b16 %v2383_v31, %v2383_v31 }
 0x878   : > { %v2236_v33 = vpop.f32.mrf.mxu3 }
 0x879   : > { %v2237_v34 = vadd.f32 %v4325_v42, %v2236_v33  ;;  %2385 = vrot.lane.b32.xlu1 %v2384_v32, %s3942_s26 }
 0x87b   : > { %v2267_v35 = vpack.c.bf16 %v2237_v34, %v2237_v34 }
 0x87d   : > { %v2409_v36 = vunpack.c.l.b16 %v2267_v35  ;;  %3603 = vmatmul.msk.bf16.vlgmr.msrb.gmra.mxu2 %vm1454_vm1, %v2267_v35 }
 0x87f   : > { %v2410_v37 = vpack.c.b16 %v2409_v36, %v2409_v36 }
 0x881   : > { %2527 = vrot.lane.b32.xlu1 %v4353_v2, %s3945_s2  ;;  %2525 = vrot.lane.b32.xlu2 %v2410_v37, %s3945_s2 }
 0x882   : > { %2411 = vrot.lane.b32.xlu0 %v2410_v37, %s3942_s26  ;;  %s4574_s26 = smov 88  }
 0x889   : > { %2618 = vrot.lane.b32.xlu1 %v4348_v22, %s4573_s28  ;;  %2616 = vrot.lane.b32.xlu2 %v2384_v32, %s4573_s28 }
 0x88a   : > { %2502 = vrot.lane.b32.xlu0 %v2384_v32, %s3945_s2  ;;  %s4575_s2 = smov 80  }
 0x891   : > { %2639 = vrot.lane.b32.xlu1 %v2410_v37, %s4573_s28  ;;  %2337 = vrot.lane.b32.xlu2 %v4348_v22, %s3944_s1 }
 0x892   : > { %2641 = vrot.lane.b32.xlu0 %v4353_v2, %s4573_s28  ;;  %s4581_s28 = smov 24  }
 0x8be   : > { %v2414_v38 = vpop.permute.xlu2 %2413 }
 0x8bf   : > { %v2419_v39 = vsel %vm1454_vm1, %v2414_v38, 0 }
 0x8c0   : > { %2428 = vmatpush.bf16.xpose.msra.mxu2 %v2419_v39 }
 0x8c6   : > { %v2505_v40 = vpop.permute.xlu2 %2504 }
 0x8c7   : > { %v2510_v41 = vsel %vm1454_vm1, %v2505_v40, 0 }
 0x8ce   : > { %v2388_v42 = vpop.permute.xlu0 %2387 }
 0x8cf   : > { %v2393_v43 = vsel %vm1454_vm1, %v2388_v42, 0 }
 0x8d0   : > { %2402 = vmatpush.bf16.xpose.msra.mxu1 %v2393_v43 }
 0x8d8   : > { %2519 = vmatpush.bf16.xpose.msrb.mxu1 %v2510_v41 }
 0x8db   : > { %v2526_v44 = vpop.permute.xlu2 %2525 }
 0x8e3   : > { %v2617_v45 = vpop.permute.xlu2 %2616 }
 0x8eb   : > { %v2386_v46 = vpop.permute.xlu1 %2385  ;;  %v2338_v47 = vpop.permute.xlu2 %2337 }
 0x8ec   : > { %v2343_v48 = vsel %vm1529_vm2, %v2338_v47, 0  ;;  %3606 = vmatmul.msk.bf16.vlgmr.msra.gmra.mxu1 %vm1454_vm1, %v2386_v46 }
 0x8ed   : > { %2352 = vmatpush.bf16.msra.mxu3 %v2343_v48 }
 0x8f2   : > { %v2285_v49 = vpop.f32.mrf.mxu1 }
 0x8f3   : > { %v2308_v50 = vmul.f32 0.35355338, %v2285_v49  ;;  %v2528_v51 = vpop.permute.xlu1 %2527 }
 0x8f4   : > { %v2533_v52 = vsel %vm1454_vm1, %v2528_v51, 0  ;;  %v2412_v53 = vpop.permute.xlu0 %2411 }
 0x8f5   : > { %3607 = vmatmul.msk.bf16.vlgmr.msra.gmra.mxu2 %vm1454_vm1, %v2412_v53  ;;  %v2310_v54 = vsel %vm1454_vm1, %v2308_v50, -inf }
 0x8f6   : > { %2542 = vmatpush.bf16.xpose.msrb.mxu2 %v2533_v52  ;;  %2311 = vmax.xlane.f32.xlu0 %v2310_v54 }
 0x8fa   : > { %v2287_v55 = vpop.f32.mrf.mxu1 }
 0x8fb   : > { %v2619_v56 = vpop.permute.xlu1 %2618 }
 0x8fc   : > { %v2624_v57 = vsel %vm1454_vm1, %v2619_v56, 0  ;;  %v2503_v58 = vpop.permute.xlu0 %2502 }
 0x8fd   : > { %3610 = vmatmul.msk.bf16.vlgmr.msrb.gmra.mxu1 %vm1454_vm1, %v2503_v58 }
 0x8fe   : > { %2633 = vmatpush.bf16.xpose.msra.mxu1 %v2624_v57 }
 0x900   : > { %v2304_v59 = vpop.f32.mrf.mxu2 }
 0x901   : > { %v2309_v60 = vmul.f32 0.35355338, %v2304_v59 }
 0x903   : > { %v2313_v61 = vsel %vm1454_vm1, %v2309_v60, -inf  ;;  %v2640_v1 = vpop.permute.xlu1 %2639 }
 0x904   : > { %v2642_v62 = vpop.permute.xlu0 %2641  ;;  %2314 = vmax.xlane.f32.xlu2 %v2313_v61 }
 0x905   : > { %v2647_v63 = vsel %vm1454_vm1, %v2642_v62, 0  ;;  %3611 = vmatmul.msk.bf16.vlgmr.msrb.gmra.mxu2 %vm1454_vm1, %v2526_v44 }
 0x906   : > { %2656 = vmatpush.bf16.xpose.msra.mxu2 %v2647_v63 }
 0x908   : > { %v2306_v0 = vpop.f32.mrf.mxu2 }
 0x90d   : > { %3614 = vmatmul.msk.bf16.vlgmr.msra.gmra.mxu1 %vm1454_vm1, %v2617_v45 }
 0x915   : > { %3615 = vmatmul.msk.bf16.vlgmr.msra.gmra.mxu2 %vm1454_vm1, %v2640_v1 }
 0x969   : > { %v2312_v5 = vpop.xlane.xlu0 %2311  ;;  %v2404_v10 = vpop.f32.mrf.mxu1 }
 0x96a   : > { %v2316_v15 = vsub.f32 %v2308_v50, %v2312_v5  ;;  %v2434_v6 = vmul.f32 0.35355338, %v2404_v10 }
 0x96c   : > { %v2318_v7 = vmul.f32 1.442695, %v2316_v15  ;;  %v2436_v8 = vsel %vm1454_vm1, %v2434_v6, -inf }
 0x96d   : > { %2437 = vmax.xlane.f32.xlu1 %v2436_v8 }
 0x96e   : > { %3864 = vpow2.f32 %v2318_v7 }
 0x971   : > { %v2406_v9 = vpop.f32.mrf.mxu1 }
 0x974   : > { %v3865_v11 = vpop.eup %3864 }
 0x975   : > { %v2322_v14 = vsel %vm1454_vm1, %v3865_v11, 0.0 }
 0x976   : > { %2323 = vadd.xlane.f32.xlu2 %v2322_v14 }
 0x977   : > { %v2315_v16 = vpop.xlane.xlu2 %2314 }
 0x978   : > { %v2317_v17 = vsub.f32 %v2309_v60, %v2315_v16  ;;  %v2430_v18 = vpop.f32.mrf.mxu2 }
 0x979   : > { %v2435_v19 = vmul.f32 0.35355338, %v2430_v18 }
 0x97a   : > { %v2320_v20 = vmul.f32 1.442695, %v2317_v17  ;;  %v2521_v21 = vpop.f32.mrf.mxu1 }
 0x97b   : > { %v2548_v23 = vmul.f32 0.35355338, %v2521_v21  ;;  %v2439_v24 = vsel %vm1454_vm1, %v2435_v19, -inf }
 0x97c   : > { %3866 = vpow2.f32 %v2320_v20  ;;  %2440 = vmax.xlane.f32.xlu0 %v2439_v24 }
 0x97d   : > { %v2550_v25 = vsel %vm1454_vm1, %v2548_v23, -inf }
 0x97e   : > { %2551 = vmax.xlane.f32.xlu2 %v2550_v25 }
 0x980   : > { %v2432_v26 = vpop.f32.mrf.mxu2 }
 0x982   : > { %v4396_v27 = vpop.eup %3866  ;;  %v2523_v29 = vpop.f32.mrf.mxu1 }
 0x983   : > { %v2325_v3 = vsel %vm1454_vm1, %v4396_v27, 0.0 }
 0x984   : > { %2326 = vadd.xlane.f32.xlu0 %v2325_v3 }
 0x988   : > { %v2544_v30 = vpop.f32.mrf.mxu2 }
 0x989   : > { %v2549_v31 = vmul.f32 0.35355338, %v2544_v30 }
 0x98a   : > { %v2635_v32 = vpop.f32.mrf.mxu1 }
 0x98b   : > { %v4400_v33 = vmul.f32 0.35355338, %v2635_v32  ;;  %v2553_v34 = vsel %vm1454_vm1, %v2549_v31, -inf }
 0x98c   : > { %2554 = vmax.xlane.f32.xlu1 %v2553_v34 }
 0x98d   : > { %v2664_v35 = vsel %vm1454_vm1, %v4400_v33, -inf }
 0x98e   : > { %2665 = vmax.xlane.f32.xlu0 %v2664_v35 }
 0x990   : > { %v2546_v36 = vpop.f32.mrf.mxu2 }
 0x992   : > { %v2637_v37 = vpop.f32.mrf.mxu1 }
 0x996   : > { %2481 = vrot.lane.b32.xlu2 %v4353_v2, %s4574_s26 }
 0x998   : > { %v2658_v38 = vpop.f32.mrf.mxu2 }
 0x999   : > { %v2663_v39 = vmul.f32 0.35355338, %v2658_v38 }
 0x99b   : > { %v2667_v40 = vsel %vm1454_vm1, %v2663_v39, -inf }
 0x99c   : > { %2668 = vmax.xlane.f32.xlu1 %v2667_v40 }
 0x9a0   : > { %v2660_v41 = vpop.f32.mrf.mxu2 }
 0x9a2   : > { %2460 = vrot.lane.b32.xlu0 %v4348_v22, %s4574_s26  ;;  %s1350_s26 = scalar_lea.vmem %s4579_s10, %s4128_s0  ;;  %s4584_s10 = sld [smem:[#allocation9_spill]] }
 0x9aa   : > { %2574 = vrot.lane.b32.xlu0 %v4348_v22, %s4575_s2 }
 0x9b5   : > { %2361 = vrot.lane.b32.xlu1 %v4353_v2, %s3944_s1  ;;  %s4576_s1 = smov 72  }
 0x9e0   : > { %v2438_v42 = vpop.xlane.xlu1 %2437 }
 0x9e1   : > { %v2442_v43 = vsub.f32 %v2434_v6, %v2438_v42 }
 0x9e3   : > { %v2444_v44 = vmul.f32 1.442695, %v2442_v43 }
 0x9e5   : > { %3868 = vpow2.f32 %v2444_v44 }
 0x9e9   : > { %v2324_v45 = vpop.xlane.xlu2 %2323 }
 0x9ea   : > { %3870 = vrcp.f32 %v2324_v45 }
 0x9eb   : > { %v4414_v46 = vpop.eup %3868 }
 0x9ec   : > { %v2448_v47 = vsel %vm1454_vm1, %v4414_v46, 0.0 }
 0x9ed   : > { %2449 = vadd.xlane.f32.xlu0 %v2448_v47 }
 0x9ef   : > { %v2441_v48 = vpop.xlane.xlu0 %2440 }
 0x9f0   : > { %v3871_v49 = vpop.eup %3870  ;;  %v2443_v50 = vsub.f32 %v2435_v19, %v2441_v48 }
 0x9f1   : > { %v2330_v51 = vmul.f32 %v3871_v49, %v3865_v11  ;;  %v2552_v52 = vpop.xlane.xlu2 %2551 }
 0x9f2   : > { %v2446_v53 = vmul.f32 1.442695, %v2443_v50  ;;  %v2556_v54 = vsub.f32 %v2548_v23, %v2552_v52 }
 0x9f3   : > { %v2332_v55 = vpack.c.bf16 %v2330_v51, %v2330_v51 }
 0x9f4   : > { %3872 = vpow2.f32 %v2446_v53  ;;  %v2558_v56 = vmul.f32 1.442695, %v2556_v54 }
 0x9f5   : > { %3604 = vmatmul.msk.bf16.vlgmr.msra.gmra.mxu3 %vm1454_vm1, %v2332_v55 }
 0x9f6   : > { %3874 = vpow2.f32 %v2558_v56 }
 0x9f7   : > { %v2327_v63 = vpop.xlane.xlu0 %2326 }
 0x9f9   : > { %v2482_v20 = vpop.permute.xlu2 %2481 }
 0x9fa   : > { %v3873_v57 = vpop.eup %3872 }
 0x9fb   : > { %v2451_v58 = vsel %vm1454_vm1, %v3873_v57, 0.0 }
 0x9fc   : > { %v3875_v59 = vpop.eup %3874  ;;  %2452 = vadd.xlane.f32.xlu0 %v2451_v58 }
 0x9fd   : > { %v2562_v60 = vsel %vm1454_vm1, %v3875_v59, 0.0 }
 0x9fe   : > { %2563 = vadd.xlane.f32.xlu1 %v2562_v60 }
 0x9ff   : > { %v2555_v61 = vpop.xlane.xlu1 %2554 }
 0xa00   : > { %v2557_v62 = vsub.f32 %v2549_v31, %v2555_v61 }
 0xa01   : > { %v2666_v10 = vpop.xlane.xlu0 %2665 }
 0xa02   : > { %v2560_v0 = vmul.f32 1.442695, %v2557_v62  ;;  %v2670_v23 = vsub.f32 %v4400_v33, %v2666_v10 }
 0xa04   : > { %3876 = vpow2.f32 %v2560_v0  ;;  %v2672_v26 = vmul.f32 1.442695, %v2670_v23 }
 0xa0a   : > { %v4421_v1 = vpop.eup %3876 }
 0xa0b   : > { %v2565_v5 = vsel %vm1454_vm1, %v4421_v1, 0.0 }
 0xa0c   : > { %2566 = vadd.xlane.f32.xlu2 %v2565_v5 }
 0xa0f   : > { %v2669_v15 = vpop.xlane.xlu1 %2668 }
 0xa10   : > { %v2671_v6 = vsub.f32 %v2663_v39, %v2669_v15  ;;  %2595 = vrot.lane.b32.xlu0 %v4353_v2, %s4575_s2  ;;  %s4582_s2 = sld [smem:[#allocation6_spill]] }
 0xa12   : > { %v2674_v7 = vmul.f32 1.442695, %v2671_v6 }
 0xa14   : > { %3878 = vpow2.f32 %v2674_v7  ;;  %v2461_v8 = vpop.permute.xlu0 %2460 }
 0xa15   : > { %v2466_v9 = vsel %vm1529_vm2, %v2461_v8, 0  ;;  %3880 = vrcp.f32 %v2327_v63 }
 0xa16   : > { %2475 = vmatpush.bf16.msrb.mxu3 %v2466_v9  ;;  %3882 = vpow2.f32 %v2672_v26  ;;  %s1356_s11 = scalar_lea.vmem %s4582_s2, %s4594_s16 }
 0xa17   : > { %2688 = vrot.lane.b32.xlu1 %v4348_v22, %s4576_s1  ;;  %v2487_v22 = vsel %vm1529_vm2, %v2482_v20, 0 }
 0xa1a   : > { %v3879_v11 = vpop.eup %3878 }
 0xa1b   : > { %v2679_v14 = vsel %vm1454_vm1, %v3879_v11, 0.0  ;;  %v3881_v18 = vpop.eup %3880 }
 0xa1c   : > { %2680 = vadd.xlane.f32.xlu2 %v2679_v14  ;;  %v2575_v16 = vpop.permute.xlu0 %2574  ;;  %v2331_v19 = vmul.f32 %v3881_v18, %v4396_v27  ;;  %v3883_v29 = vpop.eup %3882  ;;  %v3708_v18 = vld [vmem:[%s1350_s26 + $0x8] sm:$0xff] }
 0xa1d   : > { %v2580_v17 = vsel %vm1529_vm2, %v2575_v16, 0  ;;  %v2676_v27 = vsel %vm1454_vm1, %v3883_v29, 0.0  ;;  %2790 = vmatpush.bf16.msrb.mxu1 %v3708_v18 }
 0xa1e   : > { %2589 = vmatpush.bf16.msra.mxu3 %v2580_v17  ;;  %v2333_v25 = vpack.c.bf16 %v2331_v19, %v2331_v19  ;;  %v3707_v19 = vld [vmem:[%s1350_s26] sm:$0xff]  ;;  %s4586_s26 = sld [smem:[#allocation11_spill]] }
 0xa21   : > { %2791 = vmatpush.bf16.msrb.mxu1 %v3707_v19 }
 0xa27   : > { %v2362_v21 = vpop.permute.xlu1 %2361 }
 0xa28   : > { %v2367_v24 = vsel %vm1529_vm2, %v2362_v21, 0 }
 0xa29   : > { %2376 = vmatpush.bf16.msra.mxu0 %v2367_v24 }
 0xa2c   : > { %3605 = vmatmul.msk.bf16.vlgmr.msra.gmra.mxu0 %vm1454_vm1, %v2333_v25 }
 0xa2d   : > { %2496 = vmatpush.bf16.msrb.mxu0 %v2487_v22 }
 0xa34   : > { %2709 = vrot.lane.b32.xlu2 %v4353_v2, %s4576_s1  ;;  %s4583_s1 = sld [smem:[#allocation7_spill]] }
 0xa3a   : > { %2677 = vadd.xlane.f32.xlu0 %v2676_v27 }
 0xa60   : > { %v2450_v3 = vpop.xlane.xlu0 %2449 }
 0xa61   : > { %3884 = vrcp.f32 %v2450_v3 }
 0xa67   : > { %v3885_v30 = vpop.eup %3884 }
 0xa68   : > { %v2456_v31 = vmul.f32 %v3885_v30, %v4414_v46 }
 0xa6a   : > { %v2458_v32 = vpack.c.bf16 %v2456_v31, %v2456_v31 }
 0xa6c   : > { %3608 = vmatmul.msk.bf16.vlgmr.msrb.gmra.mxu3 %vm1454_vm1, %v2458_v32 }
 0xa6f   : > { %v2453_v33 = vpop.xlane.xlu0 %2452 }
 0xa70   : > { %3886 = vrcp.f32 %v2453_v33 }
 0xa71   : > { %v2564_v34 = vpop.xlane.xlu1 %2563 }
 0xa72   : > { %3888 = vrcp.f32 %v2564_v34 }
 0xa76   : > { %v3887_v35 = vpop.eup %3886 }
 0xa77   : > { %v2457_v36 = vmul.f32 %v3887_v35, %v3873_v57 }
 0xa78   : > { %v3889_v37 = vpop.eup %3888  ;;  %v4442_v2 = vpop.f32.mrf.mxu3 }
 0xa79   : > { %v2459_v38 = vpack.c.bf16 %v2457_v36, %v2457_v36  ;;  %v2570_v39 = vmul.f32 %v3889_v37, %v3875_v59  ;;  %v3813_v36 = vld [vmem:[%s1353_s18] ss:$0 sm:$0xff] }
 0xa7b   : > { %v2572_v40 = vpack.c.bf16 %v2570_v39, %v2570_v39  ;;  %3609 = vmatmul.msk.bf16.vlgmr.msrb.gmra.mxu0 %vm1454_vm1, %v2459_v38 }
 0xa7d   : > { %3612 = vmatmul.msk.bf16.vlgmr.msra.gmra.mxu3 %vm1454_vm1, %v2572_v40 }
 0xa7f   : > { %v2567_v41 = vpop.xlane.xlu2 %2566 }
 0xa80   : > { %3890 = vrcp.f32 %v2567_v41  ;;  %v2356_v42 = vpop.f32.mrf.mxu3 }
 0xa82   : > { %v2596_v43 = vpop.permute.xlu0 %2595 }
 0xa83   : > { %v2601_v44 = vsel %vm1529_vm2, %v2596_v43, 0 }
 0xa84   : > { %2610 = vmatpush.bf16.msra.mxu0 %v2601_v44 }
 0xa86   : > { %v3891_v45 = vpop.eup %3890 }
 0xa87   : > { %v2571_v46 = vmul.f32 %v3891_v45, %v4421_v1 }
 0xa89   : > { %v2573_v47 = vpack.c.bf16 %v2571_v46, %v2571_v46  ;;  %v2689_v48 = vpop.permute.xlu1 %2688 }
 0xa8a   : > { %v2694_v49 = vsel %vm1529_vm2, %v2689_v48, 0 }
 0xa8b   : > { %3613 = vmatmul.msk.bf16.vlgmr.msra.gmra.mxu0 %vm1454_vm1, %v2573_v47  ;;  %2703 = vmatpush.bf16.msrb.mxu3 %v2694_v49 }
 0xa8f   : > { %v2681_v50 = vpop.xlane.xlu2 %2680 }
 0xa90   : > { %3892 = vrcp.f32 %v2681_v50 }
 0xa96   : > { %v3893_v51 = vpop.eup %3892 }
 0xa97   : > { %v2685_v52 = vmul.f32 %v3893_v51, %v3879_v11  ;;  %v2710_v53 = vpop.permute.xlu2 %2709 }
 0xa98   : > { %v2715_v54 = vsel %vm1529_vm2, %v2710_v53, 0 }
 0xa99   : > { %v2687_v55 = vpack.c.bf16 %v2685_v52, %v2685_v52  ;;  %2724 = vmatpush.bf16.msrb.mxu0 %v2715_v54 }
 0xa9c   : > { %3617 = vmatmul.msk.bf16.vlgmr.msrb.gmra.mxu0 %vm1454_vm1, %v2687_v55 }
 0xaa9   : > { %v2378_v56 = vpop.f32.mrf.mxu0 }
 0xaad   : > { %v2678_v57 = vpop.xlane.xlu0 %2677 }
 0xaae   : > { %3894 = vrcp.f32 %v2678_v57 }
 0xab1   : > { %v2380_v58 = vpop.f32.mrf.mxu0 }
 0xab4   : > { %v3895_v59 = vpop.eup %3894 }
 0xab5   : > { %v2684_v60 = vmul.f32 %v3895_v59, %v3883_v29 }
 0xab7   : > { %v2686_v61 = vpack.c.bf16 %v2684_v60, %v2684_v60 }
 0xab9   : > { %3616 = vmatmul.msk.bf16.vlgmr.msrb.gmra.mxu3 %vm1454_vm1, %v2686_v61 }
 0xaef   : > { %v2477_v62 = vpop.f32.mrf.mxu3 }
 0xaf7   : > { %v2479_v63 = vpop.f32.mrf.mxu3 }
 0xaf8   : > { %v2498_v0 = vpop.f32.mrf.mxu0 }
 0xaf9   : > { %v3789_v1 = vpack.i.bf16 %v2498_v0, %v2477_v62 }
 0xafb   : > { %3790 = vrot.lane.b32.xlu1 %v3789_v1, %s4578_s7  ;;  %s1359_s7 = scalar_lea.vmem %s4583_s1, %s4594_s16 }
 0xb00   : > { %v2500_v5 = vpop.f32.mrf.mxu0  ;;  %v2591_v10 = vpop.f32.mrf.mxu3 }
 0xb08   : > { %v2612_v15 = vpop.f32.mrf.mxu0  ;;  %v2593_v6 = vpop.f32.mrf.mxu3 }
 0xb09   : > { %v3794_v7 = vpack.i.bf16 %v2612_v15, %v2591_v10 }
 0xb0b   : > { %3795 = vrot.lane.b32.xlu0 %v3794_v7, %s4580_s23  ;;  %s4585_s23 = sld [smem:[#allocation8_spill]] }
 0xb10   : > { %v2614_v8 = vpop.f32.mrf.mxu0 }
 0xb19   : > { %v2726_v9 = vpop.f32.mrf.mxu0 }
 0xb21   : > { %v2728_v11 = vpop.f32.mrf.mxu0 }
 0xb3c   : > { %v2705_v14 = vpop.f32.mrf.mxu3 }
 0xb3d   : > { %v3799_v16 = vpack.i.bf16 %v2726_v9, %v2705_v14  ;;  %v3814_v9 = vld [vmem:[%s1356_s11] ss:$0 sm:$0xff]  ;;  %s4588_s11 = scalar_lea.vmem %s4584_s10, %s4594_s16 }
 0xb3f   : > { %3800 = vrot.lane.b32.xlu2 %v3799_v16, %s4581_s28  ;;  %s1364_s28 = scalar_lea.vmem %s4585_s23, %s4128_s0  ;;  %s4587_s23 = sld [smem:[#allocation10_spill]] }
 0xb40   : > { %v3710_v52 = vld [vmem:[%s1364_s28 + $0x8] sm:$0xff]  ;;  %v3709_v55 = vld [vmem:[%s1364_s28] sm:$0xff]  ;;  %s1375_s28 = scalar_lea.vmem %s4586_s26, %s4594_s16  ;;  %s4590_s26 = sld [smem:[#allocation13_spill]] }
 0xb41   : > { %2886 = vmatpush.bf16.msrb.mxu2 %v3710_v52 }
 0xb44   : > { %v2707_v17 = vpop.f32.mrf.mxu3 }
 0xb45   : > { %2887 = vmatpush.bf16.msrb.mxu2 %v3709_v55  ;;  %v3815_v17 = vld [vmem:[%s1359_s7] ss:$0 sm:$0xff]  ;;  %s1372_s18 = scalar_lea.vmem %s4587_s23, %s4301_s22  ;;  %s4589_s7 = sld [smem:[#allocation12_spill]] }
 0xb6d   : > { %v3791_v20 = vpop.permute.xlu1 %3790 }
 0xb6e   : > { %v3793_v23 = vunpack.i.h.bf16 %v3791_v20  ;;  %v3792_v24 = vunpack.i.l.bf16 %v3791_v20 }
 0xb70   : > { %v2755_v29 = vsel %vm1454_vm1, %v2378_v56, %v3793_v23  ;;  %v2754_v27 = vsel %vm1454_vm1, %v4442_v2, %v3792_v24 }
 0xb7d   : > { %v3796_v21 = vpop.permute.xlu0 %3795 }
 0xb7e   : > { %v3798_v22 = vunpack.i.h.bf16 %v3796_v21  ;;  %v3797_v25 = vunpack.i.l.bf16 %v3796_v21 }
 0xb80   : > { %v2757_v31 = vsel %vm1935_vm3, %v2755_v29, %v3798_v22  ;;  %v2756_v32 = vsel %vm1935_vm3, %v2754_v27, %v3797_v25  ;;  %v3714_v22 = vld [vmem:[%s1372_s18 + $0x18] sm:$0xff]  ;;  %v3713_v25 = vld [vmem:[%s1372_s18 + $0x10] sm:$0xff]  ;;  %v3711_v29 = vld [vmem:[%s1372_s18] sm:$0xff] }
 0xb81   : > { %2944 = vmatpush.bf16.msra.mxu3 %v3714_v22 }
 0xb85   : > { %2945 = vmatpush.bf16.msra.mxu3 %v3713_v25 }
 0xb99   : > { %v3801_v26 = vpop.permute.xlu2 %3800 }
 0xb9a   : > { %v3803_v3 = vunpack.i.h.bf16 %v3801_v26  ;;  %v3802_v30 = vunpack.i.l.bf16 %v3801_v26  ;;  %v3712_v26 = vld [vmem:[%s1372_s18 + $0x8] sm:$0xff]  ;;  %s1378_s18 = scalar_lea.vmem %s4589_s7, %s4594_s16 }
 0xb9b   : > { %2946 = vmatpush.bf16.msra.mxu3 %v3712_v26 }
 0xb9c   : > { %v2758_v33 = vsel %vm1938_vm4, %v2756_v32, %v3802_v30  ;;  %v2759_v34 = vsel %vm1938_vm4, %v2757_v31, %v3803_v3  ;;  %v3816_v3 = vld [vmem:[%s4588_s11] ss:$0 sm:$0xff]  ;;  %s4591_s11 = sld [smem:[#allocation14_spill]] }
 0xb9d   : > { %v2764_v35 = vpack.c.bf16 %v2759_v34, %v2758_v33 }
 0xb9f   : > { %3626 = vmatmul.msk.bf16.vlgmr.msrb.gmra.mxu1 %vm1429_vm0, %v2764_v35  ;;  %2947 = vmatpush.bf16.msra.mxu3 %v3711_v29 }
 0xba2   : > { %s1386_s23 = scalar_lea.vmem %s4591_s11, %s4128_s0  ;;  %s1397_s11 = scalar_lea.vmem %s4110_s4, %s4594_s16 }
 0xc1c   : > { %v2793_v37 = vpop.f32.mrf.mxu1 }
 0xc1d   : > { %v2794_v2 = vadd.f32 %v3813_v36, %v2793_v37 }
 0xc1f   : > { %v2798_v38 = vadd.f32 %v2794_v2, %v4340_v12  ;;  %v3817_v2 = vld [vmem:[%s1375_s28] ss:$0 sm:$0xff]  ;;  %s1389_s28 = scalar_lea.vmem %s4100_s20, %s4594_s16 }
 0xc21   : > { %v2800_v39 = vsel %vm1429_vm0, %v2798_v38, 0.0 }
 0xc22   : > { %2801 = vadd.xlane.f32.xlu1 %v2800_v39 }
 0xc24   : > { %v2795_v40 = vpop.f32.mrf.mxu1 }
 0xc25   : > { %v2796_v41 = vadd.f32 %v3813_v36, %v2795_v40 }
 0xc27   : > { %v2799_v42 = vadd.f32 %v2796_v41, %v4342_v13 }
 0xc29   : > { %v2803_v43 = vsel %vm1429_vm0, %v2799_v42, 0.0 }
 0xc2a   : > { %2804 = vadd.xlane.f32.xlu2 %v2803_v43 }
 0xc95   : > { %v2802_v44 = vpop.xlane.xlu1 %2801 }
 0xc96   : > { %v2806_v45 = vmul.f32 %v2802_v44, %v4279_v28 }
 0xc98   : > { %v2808_v12 = vsub.f32 %v2798_v38, %v2806_v45 }
 0xc9a   : > { %v2810_v46 = vmul.f32 %v2808_v12, %v2808_v12 }
 0xc9c   : > { %v2812_v47 = vsel %vm1429_vm0, %v2810_v46, 0.0 }
 0xc9d   : > { %v2805_v48 = vpop.xlane.xlu2 %2804  ;;  %2813 = vadd.xlane.f32.xlu0 %v2812_v47 }
 0xc9e   : > { %v2807_v49 = vmul.f32 %v2805_v48, %v4279_v28 }
 0xca0   : > { %v2809_v50 = vsub.f32 %v2799_v42, %v2807_v49 }
 0xca2   : > { %v2811_v51 = vmul.f32 %v2809_v50, %v2809_v50 }
 0xca4   : > { %v2815_v13 = vsel %vm1429_vm0, %v2811_v51, 0.0 }
 0xca5   : > { %2816 = vadd.xlane.f32.xlu1 %v2815_v13 }
 0xd10   : > { %v2814_v53 = vpop.xlane.xlu0 %2813 }
 0xd11   : > { %v2818_v54 = vmul.f32 %v2814_v53, %v4279_v28 }
 0xd13   : > { %v2820_v56 = vadd.f32 1e-05, %v2818_v54  ;;  %v3716_v54 = vld [vmem:[%s1386_s23 + $0x8] sm:$0xff] }
 0xd14   : > { %3042 = vmatpush.bf16.msra.mxu0 %v3716_v54 }
 0xd15   : > { %3896 = vrsqrt.f32 %v2820_v56  ;;  %vm2828_vm2 = vweird.f32 %v2820_v56 }
 0xd18   : > { %v2817_v57 = vpop.xlane.xlu1 %2816 }
 0xd19   : > { %v2819_v58 = vmul.f32 %v2817_v57, %v4279_v28  ;;  %v3715_v57 = vld [vmem:[%s1386_s23] sm:$0xff]  ;;  %s4592_s23 = scalar_lea.vmem %s4590_s26, %s4594_s16 }
 0xd1a   : > { %3043 = vmatpush.bf16.msra.mxu0 %v3715_v57 }
 0xd1b   : > { %v3897_v59 = vpop.eup %3896  ;;  %v2821_v60 = vadd.f32 1e-05, %v2819_v58 }
 0xd1c   : > { %v2823_v61 = vmul.f32 %v3897_v59, %v2820_v56  ;;  %vm2829_vm1 = vweird.f32 %v3897_v59 }
 0xd1d   : > { %3898 = vrsqrt.f32 %v2821_v60  ;;  %vm2830_vm3 = vmor %vm2828_vm2, %vm2829_vm1  ;;  %vm2838_vm10 = vweird.f32 %v2821_v60 }
 0xd1e   : > { %v2824_v62 = vmul.f32 %v3897_v59, %v2823_v61 }
 0xd20   : > { %v2825_v63 = vmul.f32 0.5, %v2824_v62 }
 0xd22   : > { %v2826_v0 = vsub.f32 1.5, %v2825_v63 }
 0xd23   : > { %v3899_v1 = vpop.eup %3898 }
 0xd24   : > { %v2827_v5 = vmul.f32 %v3897_v59, %v2826_v0  ;;  %v2833_v10 = vmul.f32 %v3899_v1, %v2821_v60  ;;  %vm2839_vm4 = vweird.f32 %v3899_v1 }
 0xd25   : > { %vm2840_vm11 = vmor %vm2838_vm10, %vm2839_vm4 }
 0xd26   : > { %v2834_v15 = vmul.f32 %v3899_v1, %v2833_v10  ;;  %v2831_v6 = vsel %vm2830_vm3, %v3897_v59, %v2827_v5 }
 0xd27   : > { %v2842_v11 = vmul.f32 %v2831_v6, %v2808_v12 }
 0xd28   : > { %v2835_v7 = vmul.f32 0.5, %v2834_v15 }
 0xd29   : > { %v2848_v18 = vmul.f32 %v3814_v9, %v2842_v11  ;;  %v3818_v11 = vld [vmem:[%s1378_s18] ss:$0 sm:$0xff]  ;;  %s1394_s18 = scalar_lea.vmem %s4105_s27, %s4301_s22  ;;  %s1402_s22 = scalar_lea.vmem %s4115_s9, %s4128_s0 }
 0xd2a   : > { %v2836_v8 = vsub.f32 1.5, %v2835_v7  ;;  %v3718_v25 = vld [vmem:[%s1394_s18 + $0x8] sm:$0xff]  ;;  %v3720_v26 = vld [vmem:[%s1394_s18 + $0x18] sm:$0xff]  ;;  %v3719_v29 = vld [vmem:[%s1394_s18 + $0x10] sm:$0xff] }
 0xd2b   : > { %v2854_v21 = vadd.f32 %v3815_v17, %v2848_v18  ;;  %v3819_v18 = vld [vmem:[%s4592_s23] ss:$0 sm:$0xff]  ;;  %3106 = vmatpush.bf16.msra.mxu2 %v3718_v25  ;;  %3077 = vmatpush.bf16.msra.mxu1 %v3720_v26 }
 0xd2c   : > { %v2837_v14 = vmul.f32 %v3899_v1, %v2836_v8 }
 0xd2e   : > { %v2841_v16 = vsel %vm2840_vm11, %v3899_v1, %v2837_v14 }
 0xd2f   : > { %v2843_v19 = vmul.f32 %v2841_v16, %v2809_v50  ;;  %3078 = vmatpush.bf16.msra.mxu1 %v3719_v29 }
 0xd31   : > { %v2849_v20 = vmul.f32 %v3814_v9, %v2843_v19 }
 0xd32   : > { %3670 = vmatmul.msk.bf16.vlgmr.msra.gmra.mxu1 %vm1429_vm0, %v4142_v4 }
 0xd33   : > { %v2855_v23 = vadd.f32 %v3815_v17, %v2849_v20 }
 0xd35   : > { %v2860_v24 = vpack.c.bf16 %v2855_v23, %v2854_v21 }
 0xd37   : > { %3635 = vmatmul.msk.bf16.vlgmr.msrb.gmra.mxu2 %vm1429_vm0, %v2860_v24 }
 0xdba   : > { %v2889_v27 = vpop.f32.mrf.mxu2 }
 0xdbb   : > { %v2890_v30 = vadd.f32 %v3816_v3, %v2889_v27  ;;  %v3717_v27 = vld [vmem:[%s1394_s18] sm:$0xff] }
 0xdbc   : > { %3107 = vmatpush.bf16.msra.mxu2 %v3717_v27 }
 0xdbd   : > { %v2896_v32 = vmul.f32 0.01, %v2890_v30  ;;  %vm2894_vm12 = vcmp.ge.f32.partialorder %v2890_v30, 0.0 }
 0xdbf   : > { %v2898_v35 = vsel %vm2894_vm12, %v2890_v30, %v2896_v32  ;;  %v3820_v30 = vld [vmem:[%s1389_s28] ss:$0 sm:$0xff] }
 0xdc2   : > { %v2891_v31 = vpop.f32.mrf.mxu2 }
 0xdc3   : > { %v2892_v33 = vadd.f32 %v3816_v3, %v2891_v31 }
 0xdc5   : > { %vm2895_vm13 = vcmp.ge.f32.partialorder %v2892_v33, 0.0  ;;  %v2897_v34 = vmul.f32 0.01, %v2892_v33 }
 0xdc7   : > { %v2899_v36 = vsel %vm2895_vm13, %v2892_v33, %v2897_v34 }
 0xdc8   : > { %v2908_v37 = vpack.c.bf16 %v2899_v36, %v2898_v35  ;;  %v3080_v35 = vpop.f32.mrf.mxu1  ;;  %v3821_v36 = vld [vmem:[%s1397_s11] ss:$0 sm:$0xff] }
 0xdca   : > { %3652 = vmatmul.msk.bf16.vlgmr.msra.gmra.mxu3 %vm2125_vm14, %v2908_v37 }
 0xe4d   : > { %v2949_v38 = vpop.f32.mrf.mxu3 }
 0xe4e   : > { %v2950_v39 = vadd.f32 %v3817_v2, %v2949_v38 }
 0xe50   : > { %v2954_v40 = vadd.f32 %v2950_v39, %v2854_v21  ;;  %v3082_v39 = vpop.f32.mrf.mxu1 }
 0xe52   : > { %v2956_v41 = vsel %vm1429_vm0, %v2954_v40, 0.0 }
 0xe53   : > { %2957 = vadd.xlane.f32.xlu2 %v2956_v41 }
 0xe55   : > { %v2951_v42 = vpop.f32.mrf.mxu3 }
 0xe56   : > { %v2952_v43 = vadd.f32 %v3817_v2, %v2951_v42 }
 0xe58   : > { %v2955_v44 = vadd.f32 %v2952_v43, %v2855_v23 }
 0xe5a   : > { %v2959_v45 = vsel %vm1429_vm0, %v2955_v44, 0.0 }
 0xe5b   : > { %2960 = vadd.xlane.f32.xlu1 %v2959_v45 }
 0xec6   : > { %v2958_v12 = vpop.xlane.xlu2 %2957 }
 0xec7   : > { %v2962_v46 = vmul.f32 %v2958_v12, %v4279_v28 }
 0xec9   : > { %v2964_v47 = vsub.f32 %v2954_v40, %v2962_v46 }
 0xecb   : > { %v2966_v48 = vmul.f32 %v2964_v47, %v2964_v47 }
 0xecd   : > { %v2968_v49 = vsel %vm1429_vm0, %v2966_v48, 0.0 }
 0xece   : > { %v2961_v50 = vpop.xlane.xlu1 %2960  ;;  %2969 = vadd.xlane.f32.xlu2 %v2968_v49 }
 0xecf   : > { %v2963_v51 = vmul.f32 %v2961_v50, %v4279_v28 }
 0xed1   : > { %v2965_v13 = vsub.f32 %v2955_v44, %v2963_v51 }
 0xed3   : > { %v2967_v52 = vmul.f32 %v2965_v13, %v2965_v13 }
 0xed5   : > { %v2971_v53 = vsel %vm1429_vm0, %v2967_v52, 0.0 }
 0xed6   : > { %2972 = vadd.xlane.f32.xlu0 %v2971_v53 }
 0xf41   : > { %v2970_v55 = vpop.xlane.xlu2 %2969 }
 0xf42   : > { %v2974_v56 = vmul.f32 %v2970_v55, %v4279_v28 }
 0xf44   : > { %v2976_v58 = vadd.f32 1e-05, %v2974_v56 }
 0xf46   : > { %3900 = vrsqrt.f32 %v2976_v58  ;;  %vm2984_vm15 = vweird.f32 %v2976_v58 }
 0xf49   : > { %v2973_v59 = vpop.xlane.xlu0 %2972 }
 0xf4a   : > { %v2975_v60 = vmul.f32 %v2973_v59, %v4279_v28 }
 0xf4c   : > { %v3901_v61 = vpop.eup %3900  ;;  %v2977_v62 = vadd.f32 1e-05, %v2975_v60 }
 0xf4d   : > { %v2979_v63 = vmul.f32 %v3901_v61, %v2976_v58  ;;  %vm2985_vm14 = vweird.f32 %v3901_v61 }
 0xf4e   : > { %3902 = vrsqrt.f32 %v2977_v62  ;;  %vm2986_vm5 = vmor %vm2984_vm15, %vm2985_vm14  ;;  %vm2994_vm7 = vweird.f32 %v2977_v62 }
 0xf4f   : > { %v2980_v0 = vmul.f32 %v3901_v61, %v2979_v63 }
 0xf51   : > { %v2981_v1 = vmul.f32 0.5, %v2980_v0 }
 0xf53   : > { %v2982_v5 = vsub.f32 1.5, %v2981_v1 }
 0xf54   : > { %v3903_v10 = vpop.eup %3902 }
 0xf55   : > { %v2983_v15 = vmul.f32 %v3901_v61, %v2982_v5  ;;  %v2989_v6 = vmul.f32 %v3903_v10, %v2977_v62  ;;  %vm2995_vm6 = vweird.f32 %v3903_v10 }
 0xf56   : > { %vm2996_vm8 = vmor %vm2994_vm7, %vm2995_vm6 }
 0xf57   : > { %v2990_v7 = vmul.f32 %v3903_v10, %v2989_v6  ;;  %v2987_v8 = vsel %vm2986_vm5, %v3901_v61, %v2983_v15 }
 0xf58   : > { %v2998_v14 = vmul.f32 %v2987_v8, %v2964_v47 }
 0xf59   : > { %v2991_v28 = vmul.f32 0.5, %v2990_v7 }
 0xf5a   : > { %v3004_v19 = vmul.f32 %v3818_v11, %v2998_v14 }
 0xf5b   : > { %v2992_v9 = vsub.f32 1.5, %v2991_v28 }
 0xf5c   : > { %v3010_v23 = vadd.f32 %v3819_v18, %v3004_v19 }
 0xf5d   : > { %v2993_v16 = vmul.f32 %v3903_v10, %v2992_v9 }
 0xf5f   : > { %v2997_v17 = vsel %vm2996_vm8, %v3903_v10, %v2993_v16 }
 0xf60   : > { %v2999_v20 = vmul.f32 %v2997_v17, %v2965_v13 }
 0xf62   : > { %v3005_v21 = vmul.f32 %v3818_v11, %v2999_v20 }
 0xf64   : > { %v3011_v24 = vadd.f32 %v3819_v18, %v3005_v21 }
 0xf66   : > { %v3016_v22 = vpack.c.bf16 %v3011_v24, %v3010_v23 }
 0xf68   : > { %3661 = vmatmul.msk.bf16.vlgmr.msra.gmra.mxu0 %vm1429_vm0, %v3016_v22 }
 0xfe5   : > { %v3045_v3 = vpop.f32.mrf.mxu0 }
 0xfe6   : > { %v3046_v32 = vadd.f32 %v3820_v30, %v3045_v3 }
 0xfed   : > { %v3047_v31 = vpop.f32.mrf.mxu0 }
 0xfee   : > { %v3048_v33 = vadd.f32 %v3820_v30, %v3047_v31 }
 0xff0   : > { %v3058_v34 = vpack.c.bf16 %v3048_v33, %v3046_v32 }
 0xff2   : > { %3679 = vmatmul.msk.bf16.vlgmr.msra.gmra.mxu2 %vm1429_vm0, %v3058_v34 }
0x1075   : > { %v3109_v37 = vpop.f32.mrf.mxu2 }
0x1076   : > { %v3110_v2 = vadd.f32 %v3109_v37, %v3080_v35 }
0x1078   : > { %v3118_v38 = vadd.f32 %v3821_v36, %v3110_v2 }
0x107a   : > { %3120 = vst.msk [vmem:[%s1402_s22] sm:$0xff] %vm1429_vm0, %v3118_v38 }
0x107d   : > { %v3111_v40 = vpop.f32.mrf.mxu2 }
0x107e   : > { %v3112_v4 = vadd.f32 %v3111_v40, %v3082_v39 }
0x1080   : > { %v3119_v41 = vadd.f32 %v3821_v36, %v3112_v4 }
0x1082   : > { %3121 = vst.msk [vmem:[%s1402_s22 + $0x8] sm:$0xff] %vm1429_vm0, %v3119_v41 }
0x1083 PF: > { %s71_s15 = sadd.s32 1, %s3910_s15  }
0x1084   : > { %p68_p4 = scmp.ge.s32.totalorder %s71_s15, 5  }
0x1086   :  { %70 = sbr.rel (!%p68_p4) target bundleno = 51 (0x33), region = 287 }

</bundles_post_ra>
